<compile_context>
chip_gen: v5e
topology: v5e:2x2
jax: 0.10.0
libtpu: 0.0.40
codegen_flags: <defaults>
</compile_context>

<pallas_src>
import jax
import jax.numpy as jnp
from jax.experimental import pallas as pl
from jax.experimental.pallas import tpu as pltpu


# ----------------------------------------------------------------------------
# Fused kernel factory: layer-0 projection + all GRU layers + mean/std heads.
# ----------------------------------------------------------------------------
def _make_dance_enc_kernel(T, B, lay):
    Zm, Z, H, L = lay["Zm"], lay["Z"], lay["H"], lay["L"]
    G = 3 * H
    f32, bf16 = jnp.float32, jnp.bfloat16

    def kernel(xm_ref, xs_ref, w_ref, b_ref, mean_ref, std_ref, hseq_ref):
        # ---- Layer-0 input projection: the mean/std concat is folded in by
        # splitting w_i0 into its mean-half / std-half rows; one M=B*T bf16
        # matmul, fully off the serial recurrent chain.
        xm = xm_ref[...].astype(bf16)                         # (B*T, Zm), row = b*T + t
        xs = xs_ref[...].astype(bf16)
        w0 = lay["w_i0"]
        b0 = b_ref[lay["b_i0"]:lay["b_i0"] + 1, 0:G]          # (1, G)
        proj = (jnp.dot(xm, w_ref[w0:w0 + Zm, 0:G], preferred_element_type=f32)
                + jnp.dot(xs, w_ref[w0 + Zm:w0 + 2 * Zm, 0:G], preferred_element_type=f32)
                + b0)                                         # (B*T, G) f32, b-major rows

        h = None
        for l in range(L):
            oh = lay["w_h"][l]
            w_h = w_ref[oh:oh + H, 0:G]                       # (H, 3H) bf16, r|z|n dense
            ob = lay["b_hn"][l]
            b_hn = jnp.broadcast_to(b_ref[ob:ob + 1, 0:H], (B, H))   # hoisted out of t-loop
            o0 = lay["h0"][l]
            h = jnp.broadcast_to(b_ref[o0:o0 + 1, 0:H], (B, H))      # init_h.repeat(1, B, 1)
            last = (l + 1 == L)

            # Fully-unrolled recurrence (T small & static): h stays in vregs,
            # ONE dense (B, H) @ (H, 3H) MXU pass per step.
            for t in range(T):
                # Gate pre-activations from the already-computed projection —
                # independent of h, so off the serial chain.
                if l == 0:
                    xg = jnp.concatenate(
                        [proj[b * T + t:b * T + t + 1, :] for b in range(B)], axis=0)
                else:
                    xg = proj[t * B:(t + 1) * B, :]           # contiguous t-major rows
                g = jnp.dot(h.astype(bf16), w_h, preferred_element_type=f32)  # (B, G)
                rz = jax.nn.sigmoid(xg[:, 0:2 * H] + g[:, 0:2 * H])  # r|z in one EUP op
                r = rz[:, 0:H]
                z = rz[:, H:2 * H]
                n = jnp.tanh(xg[:, 2 * H:G] + r * (g[:, 2 * H:G] + b_hn))
                h = n + z * (h - n)                           # == (1 - z)*n + z*h
                if not last:
                    # Stage h for the next layer's batched input projection;
                    # store is off the serial chain.
                    hseq_ref[t * B:(t + 1) * B, :] = h

            if not last:
                # Next layer's input projection: ONE batched (T*B, H) @ (H, 3H)
                # matmul instead of T tiny per-step ones; bias broadcast once.
                oi = lay["w_i"][l + 1]
                obi = lay["b_i"][l + 1]
                proj = (jnp.dot(hseq_ref[...].astype(bf16), w_ref[oi:oi + H, 0:G],
                                preferred_element_type=f32)
                        + b_ref[obi:obi + 1, 0:G])            # (T*B, G), t-major rows

        # ---- Fused mean|std heads on the last-step hidden of the top layer
        # (== output[:, -1, :]); both heads are raw Linear layers.
        owh, obh = lay["w_head"], lay["b_head"]
        head = (jnp.dot(h.astype(bf16), w_ref[owh:owh + H, 0:2 * Z],
                        preferred_element_type=f32)
                + b_ref[obh:obh + 1, 0:2 * Z])                # (B, 2Z)
        mean_ref[...] = head[:, 0:Z]
        std_ref[...] = head[:, Z:2 * Z]

    return kernel


# ----------------------------------------------------------------------------
# Parameter init: mirrors PyTorch shapes / init ranges; weights pre-transposed,
# gate-fused, bias-folded and packed into ONE bf16 weight slab + ONE f32
# bias/state slab (static row offsets returned in `layout`).
# ----------------------------------------------------------------------------
def init_params(key, dim_z_movement, dim_z_dance, hidden_size, num_layers):
    Zm, Z, H, L = dim_z_movement, dim_z_dance, hidden_size, num_layers
    D = 2 * Zm
    G = 3 * H
    W = max(G, 2 * Z)
    bound = 1.0 / float(H) ** 0.5

    keys = iter(jax.random.split(key, num_layers * 12 + 5))

    def u(shape):
        return jax.random.uniform(next(keys), shape, jnp.float32,
                                  minval=-bound, maxval=bound)

    def pad_w(w):      # (rows, cols) -> (rows, W)
        return jnp.pad(w, ((0, 0), (0, W - w.shape[1])))

    def pad_b(v):      # (n,) -> (1, W)
        return jnp.pad(v, (0, W - v.shape[0])).reshape(1, W)

    w_rows, b_rows = [], []
    lay = {"Zm": Zm, "Z": Z, "H": H, "L": L, "W": W,
           "w_h": [], "w_i": [None], "b_hn": [], "b_i": [None], "h0": []}
    woff = 0
    boff = 0

    for l in range(num_layers):
        d_in = D if l == 0 else H
        w_ir, w_iz, w_in = u((d_in, H)), u((d_in, H)), u((d_in, H))
        w_hr, w_hz, w_hn = u((H, H)), u((H, H)), u((H, H))
        b_ir, b_iz, b_in = u((H,)), u((H,)), u((H,))
        b_hr, b_hz, b_hn = u((H,)), u((H,)), u((H,))

        w_i_f = jnp.concatenate([w_ir, w_iz, w_in], axis=1)          # (d_in, 3H)
        w_h_f = jnp.concatenate([w_hr, w_hz, w_hn], axis=1)          # (H, 3H)
        # r/z hidden biases pre-folded into the input-projection bias; b_hn
        # stays separate (it sits inside the r-gated part of the tanh).
        b_i_f = jnp.concatenate([b_ir + b_hr, b_iz + b_hz, b_in])    # (3H,)

        if l == 0:
            lay["w_i0"] = woff; w_rows.append(pad_w(w_i_f)); woff += d_in
            lay["b_i0"] = boff; b_rows.append(pad_b(b_i_f)); boff += 1
        else:
            lay["w_i"].append(woff); w_rows.append(pad_w(w_i_f)); woff += d_in
            lay["b_i"].append(boff); b_rows.append(pad_b(b_i_f)); boff += 1
        lay["w_h"].append(woff); w_rows.append(pad_w(w_h_f)); woff += H
        lay["b_hn"].append(boff); b_rows.append(pad_b(b_hn)); boff += 1

    # Learned initial hidden state (init_h), one row per layer.
    init_h = jax.random.normal(next(keys), (num_layers, H), jnp.float32)
    for l in range(num_layers):
        lay["h0"].append(boff); b_rows.append(pad_b(init_h[l])); boff += 1

    # mean / std heads fused: (H, 2Z) weight + (2Z,) bias.
    w_mean, b_mean = u((H, Z)), u((Z,))
    w_std, b_std = u((H, Z)), u((Z,))
    lay["w_head"] = woff
    w_rows.append(pad_w(jnp.concatenate([w_mean, w_std], axis=1))); woff += H
    lay["b_head"] = boff
    b_rows.append(pad_b(jnp.concatenate([b_mean, b_std]))); boff += 1

    params = {
        # bf16 weights: single-pass MXU (f32 accumulation) + half the DMA.
        "w_slab": jnp.concatenate(w_rows, axis=0).astype(jnp.bfloat16),
        # biases / init_h stay f32 (elementwise math is f32).
        "b_slab": jnp.concatenate(b_rows, axis=0),
    }
    return params, lay


# ----------------------------------------------------------------------------
# Forward
# ----------------------------------------------------------------------------
def dance_enc_forward(params, movements_mean, movements_std, *, layout):
    """movements_mean/std: (B, T, Zm) -> (mean, std), each (B, Z)."""
    B, T, Zm = movements_mean.shape
    Z, H = layout["Z"], layout["H"]

    # Free contiguous reshapes (row = b*T + t); concat + layer-0 projection +
    # gate slicing all happen inside the single pallas_call.
    xm = movements_mean.reshape(B * T, Zm)
    xs = movements_std.reshape(B * T, Zm)

    vmem = pl.BlockSpec(memory_space=pltpu.MemorySpace.VMEM)
    mean, std = pl.pallas_call(
        _make_dance_enc_kernel(T=T, B=B, lay=layout),
        out_shape=(jax.ShapeDtypeStruct((B, Z), jnp.float32),
                   jax.ShapeDtypeStruct((B, Z), jnp.float32)),
        in_specs=[vmem, vmem, vmem, vmem],
        out_specs=(vmem, vmem),
        scratch_shapes=[pltpu.VMEM((T * B, H), jnp.float32)],
    )(xm, xs, params["w_slab"], params["b_slab"])
    return mean, std


def make_forward(layout):
    @jax.jit
    def fwd(params, movements_mean, movements_std):
        return dance_enc_forward(params, movements_mean, movements_std, layout=layout)
    return fwd


# ----------------------------------------------------------------------------
# Pure-JAX reference (no Pallas) of the same math (same bf16 weight / bf16-h
# matmul quantization, f32 accumulation), used only as a correctness check.
# ----------------------------------------------------------------------------
def dance_enc_reference(params, movements_mean, movements_std, layout):
    lay = layout
    Zm, Z, H, L = lay["Zm"], lay["Z"], lay["H"], lay["L"]
    G = 3 * H
    B, T, _ = movements_mean.shape
    f32, bf16 = jnp.float32, jnp.bfloat16
    w = params["w_slab"]
    bsl = params["b_slab"]

    x = jnp.concatenate([movements_mean, movements_std], axis=2).astype(bf16)   # (B,T,D)
    w_i0 = w[lay["w_i0"]:lay["w_i0"] + 2 * Zm, 0:G]
    b_i0 = bsl[lay["b_i0"], 0:G]
    xg = jnp.einsum("btd,dg->btg", x, w_i0, preferred_element_type=f32) + b_i0  # (B,T,G)

    h = None
    for l in range(L):
        w_h = w[lay["w_h"][l]:lay["w_h"][l] + H, 0:G]
        b_hn = bsl[lay["b_hn"][l], 0:H]
        h = jnp.broadcast_to(bsl[lay["h0"][l], 0:H], (B, H))
        outs = []
        for t in range(T):
            g = jnp.dot(h.astype(bf16), w_h, preferred_element_type=f32)
            r = jax.nn.sigmoid(xg[:, t, 0:H] + g[:, 0:H])
            z = jax.nn.sigmoid(xg[:, t, H:2 * H] + g[:, H:2 * H])
            n = jnp.tanh(xg[:, t, 2 * H:G] + r * (g[:, 2 * H:G] + b_hn))
            h = n + z * (h - n)                 # == (1 - z)*n + z*h
            outs.append(h)
        if l + 1 < L:
            seq = jnp.stack(outs, axis=1).astype(bf16)                          # (B,T,H)
            w_i = w[lay["w_i"][l + 1]:lay["w_i"][l + 1] + H, 0:G]
            b_i = bsl[lay["b_i"][l + 1], 0:G]
            xg = jnp.einsum("bth,hg->btg", seq, w_i, preferred_element_type=f32) + b_i

    w_head = w[lay["w_head"]:lay["w_head"] + H, 0:2 * Z]
    b_head = bsl[lay["b_head"], 0:2 * Z]
    out = jnp.dot(h.astype(bf16), w_head, preferred_element_type=f32) + b_head
    return out[:, 0:Z], out[:, Z:2 * Z]


if __name__ == "__main__":
    # Small shapes consistent with the module's forward.
    batch, seq_len = 2, 8
    dim_z_movement, dim_z_dance = 16, 16
    hidden_size, num_layers = 32, 2

    root = jax.random.PRNGKey(0)
    pkey, k_mean, k_std = jax.random.split(root, 3)
    params, layout = init_params(pkey, dim_z_movement, dim_z_dance,
                                 hidden_size, num_layers)
    movements_mean = jax.random.normal(k_mean, (batch, seq_len, dim_z_movement), jnp.float32)
    movements_std = jax.random.normal(k_std, (batch, seq_len, dim_z_movement), jnp.float32)

    fwd = make_forward(layout)
    mean, std = fwd(params, movements_mean, movements_std)
    jax.block_until_ready((mean, std))

    assert mean.shape == (batch, dim_z_dance)
    assert std.shape == (batch, dim_z_dance)

    # Numerical sanity check against the pure-JAX reference (same quantization).
    mean_ref, std_ref = dance_enc_reference(params, movements_mean, movements_std, layout)
    assert jnp.allclose(mean, mean_ref, atol=2e-2, rtol=2e-2)
    assert jnp.allclose(std, std_ref, atol=2e-2, rtol=2e-2)

    print("KERNEL_OK")
</pallas_src>

<mosaic_0001>
module attributes {stable_mosaic.version = 11 : i64} {
  func.func @kernel(%arg0: memref<16x16xf32, #tpu.memory_space<vmem>>, %arg1: memref<16x16xf32, #tpu.memory_space<vmem>>, %arg2: memref<160x96xbf16, #tpu.memory_space<vmem>>, %arg3: memref<7x96xf32, #tpu.memory_space<vmem>>, %arg4: memref<2x16xf32, #tpu.memory_space<vmem>>, %arg5: memref<2x16xf32, #tpu.memory_space<vmem>>, %arg6: memref<16x32xf32, #tpu.memory_space<vmem>>) attributes {dimension_semantics = [], scalar_prefetch = 0 : i64, scratch_operands = 1 : i64, tpu.core_type = #tpu.core_type<tc>} {
    %c0 = arith.constant 0 : index
    %c0_0 = arith.constant 0 : index
    %0 = vector.load %arg0[%c0, %c0_0] : memref<16x16xf32, #tpu.memory_space<vmem>>, vector<16x16xf32>
    %1 = arith.truncf %0 : vector<16x16xf32> to vector<16x16xbf16>
    %c0_1 = arith.constant 0 : index
    %c0_2 = arith.constant 0 : index
    %2 = vector.load %arg1[%c0_1, %c0_2] : memref<16x16xf32, #tpu.memory_space<vmem>>, vector<16x16xf32>
    %3 = arith.truncf %2 : vector<16x16xf32> to vector<16x16xbf16>
    %c0_3 = arith.constant 0 : index
    %c0_4 = arith.constant 0 : index
    %4 = vector.load %arg3[%c0_3, %c0_4] : memref<7x96xf32, #tpu.memory_space<vmem>>, vector<1x96xf32>
    %c0_5 = arith.constant 0 : index
    %c0_6 = arith.constant 0 : index
    %5 = vector.load %arg2[%c0_5, %c0_6] : memref<160x96xbf16, #tpu.memory_space<vmem>>, vector<16x96xbf16>
    %cst = arith.constant dense<0.000000e+00> : vector<16x96xf32>
    %6 = tpu.matmul %1, %5, %cst {dimension_numbers = #tpu.dot_dimension_numbers<[1], [0], [0], [1], [0, 0, 1, 1], [], []>} : vector<16x16xbf16>, vector<16x96xbf16>, vector<16x96xf32> -> vector<16x96xf32>
    %c16 = arith.constant 16 : index
    %c0_7 = arith.constant 0 : index
    %7 = vector.load %arg2[%c16, %c0_7] : memref<160x96xbf16, #tpu.memory_space<vmem>>, vector<16x96xbf16>
    %cst_8 = arith.constant dense<0.000000e+00> : vector<16x96xf32>
    %8 = tpu.matmul %3, %7, %cst_8 {dimension_numbers = #tpu.dot_dimension_numbers<[1], [0], [0], [1], [0, 0, 1, 1], [], []>} : vector<16x16xbf16>, vector<16x96xbf16>, vector<16x96xf32> -> vector<16x96xf32>
    %9 = arith.addf %6, %8 : vector<16x96xf32>
    %10 = vector.broadcast %4 : vector<1x96xf32> to vector<16x96xf32>
    %11 = arith.addf %9, %10 : vector<16x96xf32>
    %c32 = arith.constant 32 : index
    %c0_9 = arith.constant 0 : index
    %12 = vector.load %arg2[%c32, %c0_9] : memref<160x96xbf16, #tpu.memory_space<vmem>>, vector<32x96xbf16>
    %c1 = arith.constant 1 : index
    %c0_10 = arith.constant 0 : index
    %13 = vector.load %arg3[%c1, %c0_10] : memref<7x96xf32, #tpu.memory_space<vmem>>, vector<1x32xf32>
    %14 = vector.shape_cast %13 : vector<1x32xf32> to vector<1x32xf32>
    %15 = vector.broadcast %14 : vector<1x32xf32> to vector<2x32xf32>
    %c4 = arith.constant 4 : index
    %c0_11 = arith.constant 0 : index
    %16 = vector.load %arg3[%c4, %c0_11] : memref<7x96xf32, #tpu.memory_space<vmem>>, vector<1x32xf32>
    %17 = vector.shape_cast %16 : vector<1x32xf32> to vector<1x32xf32>
    %18 = vector.broadcast %17 : vector<1x32xf32> to vector<2x32xf32>
    %19 = vector.extract_strided_slice %11 {offsets = [0, 0], sizes = [1, 96], strides = [1, 1]} : vector<16x96xf32> to vector<1x96xf32>
    %20 = vector.extract_strided_slice %11 {offsets = [8, 0], sizes = [1, 96], strides = [1, 1]} : vector<16x96xf32> to vector<1x96xf32>
    %21 = tpu.concatenate %19, %20 in 0 : vector<1x96xf32>, vector<1x96xf32> -> vector<2x96xf32>
    %22 = arith.truncf %18 : vector<2x32xf32> to vector<2x32xbf16>
    %cst_12 = arith.constant dense<0.000000e+00> : vector<2x96xf32>
    %23 = tpu.matmul %22, %12, %cst_12 {dimension_numbers = #tpu.dot_dimension_numbers<[1], [0], [0], [1], [0, 0, 1, 1], [], []>} : vector<2x32xbf16>, vector<32x96xbf16>, vector<2x96xf32> -> vector<2x96xf32>
    %24 = vector.extract_strided_slice %21 {offsets = [0, 0], sizes = [2, 64], strides = [1, 1]} : vector<2x96xf32> to vector<2x64xf32>
    %25 = vector.extract_strided_slice %23 {offsets = [0, 0], sizes = [2, 64], strides = [1, 1]} : vector<2x96xf32> to vector<2x64xf32>
    %26 = arith.addf %24, %25 : vector<2x64xf32>
    %27 = arith.negf %26 : vector<2x64xf32>
    %28 = math.exp %27 : vector<2x64xf32>
    %cst_13 = arith.constant 1.000000e+00 : f32
    %29 = vector.broadcast %cst_13 : f32 to vector<2x64xf32>
    %30 = arith.addf %29, %28 : vector<2x64xf32>
    %31 = arith.divf %29, %30 : vector<2x64xf32>
    %32 = vector.extract_strided_slice %31 {offsets = [0, 0], sizes = [2, 32], strides = [1, 1]} : vector<2x64xf32> to vector<2x32xf32>
    %33 = vector.extract_strided_slice %31 {offsets = [0, 32], sizes = [2, 32], strides = [1, 1]} : vector<2x64xf32> to vector<2x32xf32>
    %34 = vector.extract_strided_slice %21 {offsets = [0, 64], sizes = [2, 32], strides = [1, 1]} : vector<2x96xf32> to vector<2x32xf32>
    %35 = vector.extract_strided_slice %23 {offsets = [0, 64], sizes = [2, 32], strides = [1, 1]} : vector<2x96xf32> to vector<2x32xf32>
    %36 = arith.addf %35, %15 : vector<2x32xf32>
    %37 = arith.mulf %32, %36 : vector<2x32xf32>
    %38 = arith.addf %34, %37 : vector<2x32xf32>
    %39 = math.tanh %38 : vector<2x32xf32>
    %40 = arith.subf %18, %39 : vector<2x32xf32>
    %41 = arith.mulf %33, %40 : vector<2x32xf32>
    %42 = arith.addf %39, %41 : vector<2x32xf32>
    %c0_14 = arith.constant 0 : index
    %c0_15 = arith.constant 0 : index
    %43 = vector.load %arg6[%c0_14, %c0_15] : memref<16x32xf32, #tpu.memory_space<vmem>>, vector<2x32xf32>
    tpu.vector_store %arg6[%c0_14, %c0_15], %42 {strides = array<i32>} : memref<16x32xf32, #tpu.memory_space<vmem>>, vector<2x32xf32>,
    %44 = vector.extract_strided_slice %11 {offsets = [1, 0], sizes = [1, 96], strides = [1, 1]} : vector<16x96xf32> to vector<1x96xf32>
    %45 = vector.extract_strided_slice %11 {offsets = [9, 0], sizes = [1, 96], strides = [1, 1]} : vector<16x96xf32> to vector<1x96xf32>
    %46 = tpu.concatenate %44, %45 in 0 : vector<1x96xf32>, vector<1x96xf32> -> vector<2x96xf32>
    %47 = arith.truncf %42 : vector<2x32xf32> to vector<2x32xbf16>
    %cst_16 = arith.constant dense<0.000000e+00> : vector<2x96xf32>
    %48 = tpu.matmul %47, %12, %cst_16 {dimension_numbers = #tpu.dot_dimension_numbers<[1], [0], [0], [1], [0, 0, 1, 1], [], []>} : vector<2x32xbf16>, vector<32x96xbf16>, vector<2x96xf32> -> vector<2x96xf32>
    %49 = vector.extract_strided_slice %46 {offsets = [0, 0], sizes = [2, 64], strides = [1, 1]} : vector<2x96xf32> to vector<2x64xf32>
    %50 = vector.extract_strided_slice %48 {offsets = [0, 0], sizes = [2, 64], strides = [1, 1]} : vector<2x96xf32> to vector<2x64xf32>
    %51 = arith.addf %49, %50 : vector<2x64xf32>
    %52 = arith.negf %51 : vector<2x64xf32>
    %53 = math.exp %52 : vector<2x64xf32>
    %cst_17 = arith.constant 1.000000e+00 : f32
    %54 = vector.broadcast %cst_17 : f32 to vector<2x64xf32>
    %55 = arith.addf %54, %53 : vector<2x64xf32>
    %56 = arith.divf %54, %55 : vector<2x64xf32>
    %57 = vector.extract_strided_slice %56 {offsets = [0, 0], sizes = [2, 32], strides = [1, 1]} : vector<2x64xf32> to vector<2x32xf32>
    %58 = vector.extract_strided_slice %56 {offsets = [0, 32], sizes = [2, 32], strides = [1, 1]} : vector<2x64xf32> to vector<2x32xf32>
    %59 = vector.extract_strided_slice %46 {offsets = [0, 64], sizes = [2, 32], strides = [1, 1]} : vector<2x96xf32> to vector<2x32xf32>
    %60 = vector.extract_strided_slice %48 {offsets = [0, 64], sizes = [2, 32], strides = [1, 1]} : vector<2x96xf32> to vector<2x32xf32>
    %61 = arith.addf %60, %15 : vector<2x32xf32>
    %62 = arith.mulf %57, %61 : vector<2x32xf32>
    %63 = arith.addf %59, %62 : vector<2x32xf32>
    %64 = math.tanh %63 : vector<2x32xf32>
    %65 = arith.subf %42, %64 : vector<2x32xf32>
    %66 = arith.mulf %58, %65 : vector<2x32xf32>
    %67 = arith.addf %64, %66 : vector<2x32xf32>
    %c2 = arith.constant 2 : index
    %c0_18 = arith.constant 0 : index
    %68 = vector.load %arg6[%c2, %c0_18] : memref<16x32xf32, #tpu.memory_space<vmem>>, vector<2x32xf32>
    tpu.vector_store %arg6[%c2, %c0_18], %67 {strides = array<i32>} : memref<16x32xf32, #tpu.memory_space<vmem>>, vector<2x32xf32>,
    %69 = vector.extract_strided_slice %11 {offsets = [2, 0], sizes = [1, 96], strides = [1, 1]} : vector<16x96xf32> to vector<1x96xf32>
    %70 = vector.extract_strided_slice %11 {offsets = [10, 0], sizes = [1, 96], strides = [1, 1]} : vector<16x96xf32> to vector<1x96xf32>
    %71 = tpu.concatenate %69, %70 in 0 : vector<1x96xf32>, vector<1x96xf32> -> vector<2x96xf32>
    %72 = arith.truncf %67 : vector<2x32xf32> to vector<2x32xbf16>
    %cst_19 = arith.constant dense<0.000000e+00> : vector<2x96xf32>
    %73 = tpu.matmul %72, %12, %cst_19 {dimension_numbers = #tpu.dot_dimension_numbers<[1], [0], [0], [1], [0, 0, 1, 1], [], []>} : vector<2x32xbf16>, vector<32x96xbf16>, vector<2x96xf32> -> vector<2x96xf32>
    %74 = vector.extract_strided_slice %71 {offsets = [0, 0], sizes = [2, 64], strides = [1, 1]} : vector<2x96xf32> to vector<2x64xf32>
    %75 = vector.extract_strided_slice %73 {offsets = [0, 0], sizes = [2, 64], strides = [1, 1]} : vector<2x96xf32> to vector<2x64xf32>
    %76 = arith.addf %74, %75 : vector<2x64xf32>
    %77 = arith.negf %76 : vector<2x64xf32>
    %78 = math.exp %77 : vector<2x64xf32>
    %cst_20 = arith.constant 1.000000e+00 : f32
    %79 = vector.broadcast %cst_20 : f32 to vector<2x64xf32>
    %80 = arith.addf %79, %78 : vector<2x64xf32>
    %81 = arith.divf %79, %80 : vector<2x64xf32>
    %82 = vector.extract_strided_slice %81 {offsets = [0, 0], sizes = [2, 32], strides = [1, 1]} : vector<2x64xf32> to vector<2x32xf32>
    %83 = vector.extract_strided_slice %81 {offsets = [0, 32], sizes = [2, 32], strides = [1, 1]} : vector<2x64xf32> to vector<2x32xf32>
    %84 = vector.extract_strided_slice %71 {offsets = [0, 64], sizes = [2, 32], strides = [1, 1]} : vector<2x96xf32> to vector<2x32xf32>
    %85 = vector.extract_strided_slice %73 {offsets = [0, 64], sizes = [2, 32], strides = [1, 1]} : vector<2x96xf32> to vector<2x32xf32>
    %86 = arith.addf %85, %15 : vector<2x32xf32>
    %87 = arith.mulf %82, %86 : vector<2x32xf32>
    %88 = arith.addf %84, %87 : vector<2x32xf32>
    %89 = math.tanh %88 : vector<2x32xf32>
    %90 = arith.subf %67, %89 : vector<2x32xf32>
    %91 = arith.mulf %83, %90 : vector<2x32xf32>
    %92 = arith.addf %89, %91 : vector<2x32xf32>
    %c4_21 = arith.constant 4 : index
    %c0_22 = arith.constant 0 : index
    %93 = vector.load %arg6[%c4_21, %c0_22] : memref<16x32xf32, #tpu.memory_space<vmem>>, vector<2x32xf32>
    tpu.vector_store %arg6[%c4_21, %c0_22], %92 {strides = array<i32>} : memref<16x32xf32, #tpu.memory_space<vmem>>, vector<2x32xf32>,
    %94 = vector.extract_strided_slice %11 {offsets = [3, 0], sizes = [1, 96], strides = [1, 1]} : vector<16x96xf32> to vector<1x96xf32>
    %95 = vector.extract_strided_slice %11 {offsets = [11, 0], sizes = [1, 96], strides = [1, 1]} : vector<16x96xf32> to vector<1x96xf32>
    %96 = tpu.concatenate %94, %95 in 0 : vector<1x96xf32>, vector<1x96xf32> -> vector<2x96xf32>
    %97 = arith.truncf %92 : vector<2x32xf32> to vector<2x32xbf16>
    %cst_23 = arith.constant dense<0.000000e+00> : vector<2x96xf32>
    %98 = tpu.matmul %97, %12, %cst_23 {dimension_numbers = #tpu.dot_dimension_numbers<[1], [0], [0], [1], [0, 0, 1, 1], [], []>} : vector<2x32xbf16>, vector<32x96xbf16>, vector<2x96xf32> -> vector<2x96xf32>
    %99 = vector.extract_strided_slice %96 {offsets = [0, 0], sizes = [2, 64], strides = [1, 1]} : vector<2x96xf32> to vector<2x64xf32>
    %100 = vector.extract_strided_slice %98 {offsets = [0, 0], sizes = [2, 64], strides = [1, 1]} : vector<2x96xf32> to vector<2x64xf32>
    %101 = arith.addf %99, %100 : vector<2x64xf32>
    %102 = arith.negf %101 : vector<2x64xf32>
    %103 = math.exp %102 : vector<2x64xf32>
    %cst_24 = arith.constant 1.000000e+00 : f32
    %104 = vector.broadcast %cst_24 : f32 to vector<2x64xf32>
    %105 = arith.addf %104, %103 : vector<2x64xf32>
    %106 = arith.divf %104, %105 : vector<2x64xf32>
    %107 = vector.extract_strided_slice %106 {offsets = [0, 0], sizes = [2, 32], strides = [1, 1]} : vector<2x64xf32> to vector<2x32xf32>
    %108 = vector.extract_strided_slice %106 {offsets = [0, 32], sizes = [2, 32], strides = [1, 1]} : vector<2x64xf32> to vector<2x32xf32>
    %109 = vector.extract_strided_slice %96 {offsets = [0, 64], sizes = [2, 32], strides = [1, 1]} : vector<2x96xf32> to vector<2x32xf32>
    %110 = vector.extract_strided_slice %98 {offsets = [0, 64], sizes = [2, 32], strides = [1, 1]} : vector<2x96xf32> to vector<2x32xf32>
    %111 = arith.addf %110, %15 : vector<2x32xf32>
    %112 = arith.mulf %107, %111 : vector<2x32xf32>
    %113 = arith.addf %109, %112 : vector<2x32xf32>
    %114 = math.tanh %113 : vector<2x32xf32>
    %115 = arith.subf %92, %114 : vector<2x32xf32>
    %116 = arith.mulf %108, %115 : vector<2x32xf32>
    %117 = arith.addf %114, %116 : vector<2x32xf32>
    %c6 = arith.constant 6 : index
    %c0_25 = arith.constant 0 : index
    %118 = vector.load %arg6[%c6, %c0_25] : memref<16x32xf32, #tpu.memory_space<vmem>>, vector<2x32xf32>
    tpu.vector_store %arg6[%c6, %c0_25], %117 {strides = array<i32>} : memref<16x32xf32, #tpu.memory_space<vmem>>, vector<2x32xf32>,
    %119 = vector.extract_strided_slice %11 {offsets = [4, 0], sizes = [1, 96], strides = [1, 1]} : vector<16x96xf32> to vector<1x96xf32>
    %120 = vector.extract_strided_slice %11 {offsets = [12, 0], sizes = [1, 96], strides = [1, 1]} : vector<16x96xf32> to vector<1x96xf32>
    %121 = tpu.concatenate %119, %120 in 0 : vector<1x96xf32>, vector<1x96xf32> -> vector<2x96xf32>
    %122 = arith.truncf %117 : vector<2x32xf32> to vector<2x32xbf16>
    %cst_26 = arith.constant dense<0.000000e+00> : vector<2x96xf32>
    %123 = tpu.matmul %122, %12, %cst_26 {dimension_numbers = #tpu.dot_dimension_numbers<[1], [0], [0], [1], [0, 0, 1, 1], [], []>} : vector<2x32xbf16>, vector<32x96xbf16>, vector<2x96xf32> -> vector<2x96xf32>
    %124 = vector.extract_strided_slice %121 {offsets = [0, 0], sizes = [2, 64], strides = [1, 1]} : vector<2x96xf32> to vector<2x64xf32>
    %125 = vector.extract_strided_slice %123 {offsets = [0, 0], sizes = [2, 64], strides = [1, 1]} : vector<2x96xf32> to vector<2x64xf32>
    %126 = arith.addf %124, %125 : vector<2x64xf32>
    %127 = arith.negf %126 : vector<2x64xf32>
    %128 = math.exp %127 : vector<2x64xf32>
    %cst_27 = arith.constant 1.000000e+00 : f32
    %129 = vector.broadcast %cst_27 : f32 to vector<2x64xf32>
    %130 = arith.addf %129, %128 : vector<2x64xf32>
    %131 = arith.divf %129, %130 : vector<2x64xf32>
    %132 = vector.extract_strided_slice %131 {offsets = [0, 0], sizes = [2, 32], strides = [1, 1]} : vector<2x64xf32> to vector<2x32xf32>
    %133 = vector.extract_strided_slice %131 {offsets = [0, 32], sizes = [2, 32], strides = [1, 1]} : vector<2x64xf32> to vector<2x32xf32>
    %134 = vector.extract_strided_slice %121 {offsets = [0, 64], sizes = [2, 32], strides = [1, 1]} : vector<2x96xf32> to vector<2x32xf32>
    %135 = vector.extract_strided_slice %123 {offsets = [0, 64], sizes = [2, 32], strides = [1, 1]} : vector<2x96xf32> to vector<2x32xf32>
    %136 = arith.addf %135, %15 : vector<2x32xf32>
    %137 = arith.mulf %132, %136 : vector<2x32xf32>
    %138 = arith.addf %134, %137 : vector<2x32xf32>
    %139 = math.tanh %138 : vector<2x32xf32>
    %140 = arith.subf %117, %139 : vector<2x32xf32>
    %141 = arith.mulf %133, %140 : vector<2x32xf32>
    %142 = arith.addf %139, %141 : vector<2x32xf32>
    %c8 = arith.constant 8 : index
    %c0_28 = arith.constant 0 : index
    %143 = vector.load %arg6[%c8, %c0_28] : memref<16x32xf32, #tpu.memory_space<vmem>>, vector<2x32xf32>
    tpu.vector_store %arg6[%c8, %c0_28], %142 {strides = array<i32>} : memref<16x32xf32, #tpu.memory_space<vmem>>, vector<2x32xf32>,
    %144 = vector.extract_strided_slice %11 {offsets = [5, 0], sizes = [1, 96], strides = [1, 1]} : vector<16x96xf32> to vector<1x96xf32>
    %145 = vector.extract_strided_slice %11 {offsets = [13, 0], sizes = [1, 96], strides = [1, 1]} : vector<16x96xf32> to vector<1x96xf32>
    %146 = tpu.concatenate %144, %145 in 0 : vector<1x96xf32>, vector<1x96xf32> -> vector<2x96xf32>
    %147 = arith.truncf %142 : vector<2x32xf32> to vector<2x32xbf16>
    %cst_29 = arith.constant dense<0.000000e+00> : vector<2x96xf32>
    %148 = tpu.matmul %147, %12, %cst_29 {dimension_numbers = #tpu.dot_dimension_numbers<[1], [0], [0], [1], [0, 0, 1, 1], [], []>} : vector<2x32xbf16>, vector<32x96xbf16>, vector<2x96xf32> -> vector<2x96xf32>
    %149 = vector.extract_strided_slice %146 {offsets = [0, 0], sizes = [2, 64], strides = [1, 1]} : vector<2x96xf32> to vector<2x64xf32>
    %150 = vector.extract_strided_slice %148 {offsets = [0, 0], sizes = [2, 64], strides = [1, 1]} : vector<2x96xf32> to vector<2x64xf32>
    %151 = arith.addf %149, %150 : vector<2x64xf32>
    %152 = arith.negf %151 : vector<2x64xf32>
    %153 = math.exp %152 : vector<2x64xf32>
    %cst_30 = arith.constant 1.000000e+00 : f32
    %154 = vector.broadcast %cst_30 : f32 to vector<2x64xf32>
    %155 = arith.addf %154, %153 : vector<2x64xf32>
    %156 = arith.divf %154, %155 : vector<2x64xf32>
    %157 = vector.extract_strided_slice %156 {offsets = [0, 0], sizes = [2, 32], strides = [1, 1]} : vector<2x64xf32> to vector<2x32xf32>
    %158 = vector.extract_strided_slice %156 {offsets = [0, 32], sizes = [2, 32], strides = [1, 1]} : vector<2x64xf32> to vector<2x32xf32>
    %159 = vector.extract_strided_slice %146 {offsets = [0, 64], sizes = [2, 32], strides = [1, 1]} : vector<2x96xf32> to vector<2x32xf32>
    %160 = vector.extract_strided_slice %148 {offsets = [0, 64], sizes = [2, 32], strides = [1, 1]} : vector<2x96xf32> to vector<2x32xf32>
    %161 = arith.addf %160, %15 : vector<2x32xf32>
    %162 = arith.mulf %157, %161 : vector<2x32xf32>
    %163 = arith.addf %159, %162 : vector<2x32xf32>
    %164 = math.tanh %163 : vector<2x32xf32>
    %165 = arith.subf %142, %164 : vector<2x32xf32>
    %166 = arith.mulf %158, %165 : vector<2x32xf32>
    %167 = arith.addf %164, %166 : vector<2x32xf32>
    %c10 = arith.constant 10 : index
    %c0_31 = arith.constant 0 : index
    %168 = vector.load %arg6[%c10, %c0_31] : memref<16x32xf32, #tpu.memory_space<vmem>>, vector<2x32xf32>
    tpu.vector_store %arg6[%c10, %c0_31], %167 {strides = array<i32>} : memref<16x32xf32, #tpu.memory_space<vmem>>, vector<2x32xf32>,
    %169 = vector.extract_strided_slice %11 {offsets = [6, 0], sizes = [1, 96], strides = [1, 1]} : vector<16x96xf32> to vector<1x96xf32>
    %170 = vector.extract_strided_slice %11 {offsets = [14, 0], sizes = [1, 96], strides = [1, 1]} : vector<16x96xf32> to vector<1x96xf32>
    %171 = tpu.concatenate %169, %170 in 0 : vector<1x96xf32>, vector<1x96xf32> -> vector<2x96xf32>
    %172 = arith.truncf %167 : vector<2x32xf32> to vector<2x32xbf16>
    %cst_32 = arith.constant dense<0.000000e+00> : vector<2x96xf32>
    %173 = tpu.matmul %172, %12, %cst_32 {dimension_numbers = #tpu.dot_dimension_numbers<[1], [0], [0], [1], [0, 0, 1, 1], [], []>} : vector<2x32xbf16>, vector<32x96xbf16>, vector<2x96xf32> -> vector<2x96xf32>
    %174 = vector.extract_strided_slice %171 {offsets = [0, 0], sizes = [2, 64], strides = [1, 1]} : vector<2x96xf32> to vector<2x64xf32>
    %175 = vector.extract_strided_slice %173 {offsets = [0, 0], sizes = [2, 64], strides = [1, 1]} : vector<2x96xf32> to vector<2x64xf32>
    %176 = arith.addf %174, %175 : vector<2x64xf32>
    %177 = arith.negf %176 : vector<2x64xf32>
    %178 = math.exp %177 : vector<2x64xf32>
    %cst_33 = arith.constant 1.000000e+00 : f32
    %179 = vector.broadcast %cst_33 : f32 to vector<2x64xf32>
    %180 = arith.addf %179, %178 : vector<2x64xf32>
    %181 = arith.divf %179, %180 : vector<2x64xf32>
    %182 = vector.extract_strided_slice %181 {offsets = [0, 0], sizes = [2, 32], strides = [1, 1]} : vector<2x64xf32> to vector<2x32xf32>
    %183 = vector.extract_strided_slice %181 {offsets = [0, 32], sizes = [2, 32], strides = [1, 1]} : vector<2x64xf32> to vector<2x32xf32>
    %184 = vector.extract_strided_slice %171 {offsets = [0, 64], sizes = [2, 32], strides = [1, 1]} : vector<2x96xf32> to vector<2x32xf32>
    %185 = vector.extract_strided_slice %173 {offsets = [0, 64], sizes = [2, 32], strides = [1, 1]} : vector<2x96xf32> to vector<2x32xf32>
    %186 = arith.addf %185, %15 : vector<2x32xf32>
    %187 = arith.mulf %182, %186 : vector<2x32xf32>
    %188 = arith.addf %184, %187 : vector<2x32xf32>
    %189 = math.tanh %188 : vector<2x32xf32>
    %190 = arith.subf %167, %189 : vector<2x32xf32>
    %191 = arith.mulf %183, %190 : vector<2x32xf32>
    %192 = arith.addf %189, %191 : vector<2x32xf32>
    %c12 = arith.constant 12 : index
    %c0_34 = arith.constant 0 : index
    %193 = vector.load %arg6[%c12, %c0_34] : memref<16x32xf32, #tpu.memory_space<vmem>>, vector<2x32xf32>
    tpu.vector_store %arg6[%c12, %c0_34], %192 {strides = array<i32>} : memref<16x32xf32, #tpu.memory_space<vmem>>, vector<2x32xf32>,
    %194 = vector.extract_strided_slice %11 {offsets = [7, 0], sizes = [1, 96], strides = [1, 1]} : vector<16x96xf32> to vector<1x96xf32>
    %195 = vector.extract_strided_slice %11 {offsets = [15, 0], sizes = [1, 96], strides = [1, 1]} : vector<16x96xf32> to vector<1x96xf32>
    %196 = tpu.concatenate %194, %195 in 0 : vector<1x96xf32>, vector<1x96xf32> -> vector<2x96xf32>
    %197 = arith.truncf %192 : vector<2x32xf32> to vector<2x32xbf16>
    %cst_35 = arith.constant dense<0.000000e+00> : vector<2x96xf32>
    %198 = tpu.matmul %197, %12, %cst_35 {dimension_numbers = #tpu.dot_dimension_numbers<[1], [0], [0], [1], [0, 0, 1, 1], [], []>} : vector<2x32xbf16>, vector<32x96xbf16>, vector<2x96xf32> -> vector<2x96xf32>
    %199 = vector.extract_strided_slice %196 {offsets = [0, 0], sizes = [2, 64], strides = [1, 1]} : vector<2x96xf32> to vector<2x64xf32>
    %200 = vector.extract_strided_slice %198 {offsets = [0, 0], sizes = [2, 64], strides = [1, 1]} : vector<2x96xf32> to vector<2x64xf32>
    %201 = arith.addf %199, %200 : vector<2x64xf32>
    %202 = arith.negf %201 : vector<2x64xf32>
    %203 = math.exp %202 : vector<2x64xf32>
    %cst_36 = arith.constant 1.000000e+00 : f32
    %204 = vector.broadcast %cst_36 : f32 to vector<2x64xf32>
    %205 = arith.addf %204, %203 : vector<2x64xf32>
    %206 = arith.divf %204, %205 : vector<2x64xf32>
    %207 = vector.extract_strided_slice %206 {offsets = [0, 0], sizes = [2, 32], strides = [1, 1]} : vector<2x64xf32> to vector<2x32xf32>
    %208 = vector.extract_strided_slice %206 {offsets = [0, 32], sizes = [2, 32], strides = [1, 1]} : vector<2x64xf32> to vector<2x32xf32>
    %209 = vector.extract_strided_slice %196 {offsets = [0, 64], sizes = [2, 32], strides = [1, 1]} : vector<2x96xf32> to vector<2x32xf32>
    %210 = vector.extract_strided_slice %198 {offsets = [0, 64], sizes = [2, 32], strides = [1, 1]} : vector<2x96xf32> to vector<2x32xf32>
    %211 = arith.addf %210, %15 : vector<2x32xf32>
    %212 = arith.mulf %207, %211 : vector<2x32xf32>
    %213 = arith.addf %209, %212 : vector<2x32xf32>
    %214 = math.tanh %213 : vector<2x32xf32>
    %215 = arith.subf %192, %214 : vector<2x32xf32>
    %216 = arith.mulf %208, %215 : vector<2x32xf32>
    %217 = arith.addf %214, %216 : vector<2x32xf32>
    %c14 = arith.constant 14 : index
    %c0_37 = arith.constant 0 : index
    %218 = vector.load %arg6[%c14, %c0_37] : memref<16x32xf32, #tpu.memory_space<vmem>>, vector<2x32xf32>
    tpu.vector_store %arg6[%c14, %c0_37], %217 {strides = array<i32>} : memref<16x32xf32, #tpu.memory_space<vmem>>, vector<2x32xf32>,
    %c0_38 = arith.constant 0 : index
    %c0_39 = arith.constant 0 : index
    %219 = vector.load %arg6[%c0_38, %c0_39] : memref<16x32xf32, #tpu.memory_space<vmem>>, vector<16x32xf32>
    %220 = arith.truncf %219 : vector<16x32xf32> to vector<16x32xbf16>
    %c64 = arith.constant 64 : index
    %c0_40 = arith.constant 0 : index
    %221 = vector.load %arg2[%c64, %c0_40] : memref<160x96xbf16, #tpu.memory_space<vmem>>, vector<32x96xbf16>
    %cst_41 = arith.constant dense<0.000000e+00> : vector<16x96xf32>
    %222 = tpu.matmul %220, %221, %cst_41 {dimension_numbers = #tpu.dot_dimension_numbers<[1], [0], [0], [1], [0, 0, 1, 1], [], []>} : vector<16x32xbf16>, vector<32x96xbf16>, vector<16x96xf32> -> vector<16x96xf32>
    %c2_42 = arith.constant 2 : index
    %c0_43 = arith.constant 0 : index
    %223 = vector.load %arg3[%c2_42, %c0_43] : memref<7x96xf32, #tpu.memory_space<vmem>>, vector<1x96xf32>
    %224 = vector.broadcast %223 : vector<1x96xf32> to vector<16x96xf32>
    %225 = arith.addf %222, %224 : vector<16x96xf32>
    %c96 = arith.constant 96 : index
    %c0_44 = arith.constant 0 : index
    %226 = vector.load %arg2[%c96, %c0_44] : memref<160x96xbf16, #tpu.memory_space<vmem>>, vector<32x96xbf16>
    %c3 = arith.constant 3 : index
    %c0_45 = arith.constant 0 : index
    %227 = vector.load %arg3[%c3, %c0_45] : memref<7x96xf32, #tpu.memory_space<vmem>>, vector<1x32xf32>
    %228 = vector.shape_cast %227 : vector<1x32xf32> to vector<1x32xf32>
    %229 = vector.broadcast %228 : vector<1x32xf32> to vector<2x32xf32>
    %c5 = arith.constant 5 : index
    %c0_46 = arith.constant 0 : index
    %230 = vector.load %arg3[%c5, %c0_46] : memref<7x96xf32, #tpu.memory_space<vmem>>, vector<1x32xf32>
    %231 = vector.shape_cast %230 : vector<1x32xf32> to vector<1x32xf32>
    %232 = vector.broadcast %231 : vector<1x32xf32> to vector<2x32xf32>
    %233 = vector.extract_strided_slice %225 {offsets = [0, 0], sizes = [2, 96], strides = [1, 1]} : vector<16x96xf32> to vector<2x96xf32>
    %234 = arith.truncf %232 : vector<2x32xf32> to vector<2x32xbf16>
    %cst_47 = arith.constant dense<0.000000e+00> : vector<2x96xf32>
    %235 = tpu.matmul %234, %226, %cst_47 {dimension_numbers = #tpu.dot_dimension_numbers<[1], [0], [0], [1], [0, 0, 1, 1], [], []>} : vector<2x32xbf16>, vector<32x96xbf16>, vector<2x96xf32> -> vector<2x96xf32>
    %236 = vector.extract_strided_slice %233 {offsets = [0, 0], sizes = [2, 64], strides = [1, 1]} : vector<2x96xf32> to vector<2x64xf32>
    %237 = vector.extract_strided_slice %235 {offsets = [0, 0], sizes = [2, 64], strides = [1, 1]} : vector<2x96xf32> to vector<2x64xf32>
    %238 = arith.addf %236, %237 : vector<2x64xf32>
    %239 = arith.negf %238 : vector<2x64xf32>
    %240 = math.exp %239 : vector<2x64xf32>
    %cst_48 = arith.constant 1.000000e+00 : f32
    %241 = vector.broadcast %cst_48 : f32 to vector<2x64xf32>
    %242 = arith.addf %241, %240 : vector<2x64xf32>
    %243 = arith.divf %241, %242 : vector<2x64xf32>
    %244 = vector.extract_strided_slice %243 {offsets = [0, 0], sizes = [2, 32], strides = [1, 1]} : vector<2x64xf32> to vector<2x32xf32>
    %245 = vector.extract_strided_slice %243 {offsets = [0, 32], sizes = [2, 32], strides = [1, 1]} : vector<2x64xf32> to vector<2x32xf32>
    %246 = vector.extract_strided_slice %233 {offsets = [0, 64], sizes = [2, 32], strides = [1, 1]} : vector<2x96xf32> to vector<2x32xf32>
    %247 = vector.extract_strided_slice %235 {offsets = [0, 64], sizes = [2, 32], strides = [1, 1]} : vector<2x96xf32> to vector<2x32xf32>
    %248 = arith.addf %247, %229 : vector<2x32xf32>
    %249 = arith.mulf %244, %248 : vector<2x32xf32>
    %250 = arith.addf %246, %249 : vector<2x32xf32>
    %251 = math.tanh %250 : vector<2x32xf32>
    %252 = arith.subf %232, %251 : vector<2x32xf32>
    %253 = arith.mulf %245, %252 : vector<2x32xf32>
    %254 = arith.addf %251, %253 : vector<2x32xf32>
    %255 = vector.extract_strided_slice %225 {offsets = [2, 0], sizes = [2, 96], strides = [1, 1]} : vector<16x96xf32> to vector<2x96xf32>
    %256 = arith.truncf %254 : vector<2x32xf32> to vector<2x32xbf16>
    %cst_49 = arith.constant dense<0.000000e+00> : vector<2x96xf32>
    %257 = tpu.matmul %256, %226, %cst_49 {dimension_numbers = #tpu.dot_dimension_numbers<[1], [0], [0], [1], [0, 0, 1, 1], [], []>} : vector<2x32xbf16>, vector<32x96xbf16>, vector<2x96xf32> -> vector<2x96xf32>
    %258 = vector.extract_strided_slice %255 {offsets = [0, 0], sizes = [2, 64], strides = [1, 1]} : vector<2x96xf32> to vector<2x64xf32>
    %259 = vector.extract_strided_slice %257 {offsets = [0, 0], sizes = [2, 64], strides = [1, 1]} : vector<2x96xf32> to vector<2x64xf32>
    %260 = arith.addf %258, %259 : vector<2x64xf32>
    %261 = arith.negf %260 : vector<2x64xf32>
    %262 = math.exp %261 : vector<2x64xf32>
    %cst_50 = arith.constant 1.000000e+00 : f32
    %263 = vector.broadcast %cst_50 : f32 to vector<2x64xf32>
    %264 = arith.addf %263, %262 : vector<2x64xf32>
    %265 = arith.divf %263, %264 : vector<2x64xf32>
    %266 = vector.extract_strided_slice %265 {offsets = [0, 0], sizes = [2, 32], strides = [1, 1]} : vector<2x64xf32> to vector<2x32xf32>
    %267 = vector.extract_strided_slice %265 {offsets = [0, 32], sizes = [2, 32], strides = [1, 1]} : vector<2x64xf32> to vector<2x32xf32>
    %268 = vector.extract_strided_slice %255 {offsets = [0, 64], sizes = [2, 32], strides = [1, 1]} : vector<2x96xf32> to vector<2x32xf32>
    %269 = vector.extract_strided_slice %257 {offsets = [0, 64], sizes = [2, 32], strides = [1, 1]} : vector<2x96xf32> to vector<2x32xf32>
    %270 = arith.addf %269, %229 : vector<2x32xf32>
    %271 = arith.mulf %266, %270 : vector<2x32xf32>
    %272 = arith.addf %268, %271 : vector<2x32xf32>
    %273 = math.tanh %272 : vector<2x32xf32>
    %274 = arith.subf %254, %273 : vector<2x32xf32>
    %275 = arith.mulf %267, %274 : vector<2x32xf32>
    %276 = arith.addf %273, %275 : vector<2x32xf32>
    %277 = vector.extract_strided_slice %225 {offsets = [4, 0], sizes = [2, 96], strides = [1, 1]} : vector<16x96xf32> to vector<2x96xf32>
    %278 = arith.truncf %276 : vector<2x32xf32> to vector<2x32xbf16>
    %cst_51 = arith.constant dense<0.000000e+00> : vector<2x96xf32>
    %279 = tpu.matmul %278, %226, %cst_51 {dimension_numbers = #tpu.dot_dimension_numbers<[1], [0], [0], [1], [0, 0, 1, 1], [], []>} : vector<2x32xbf16>, vector<32x96xbf16>, vector<2x96xf32> -> vector<2x96xf32>
    %280 = vector.extract_strided_slice %277 {offsets = [0, 0], sizes = [2, 64], strides = [1, 1]} : vector<2x96xf32> to vector<2x64xf32>
    %281 = vector.extract_strided_slice %279 {offsets = [0, 0], sizes = [2, 64], strides = [1, 1]} : vector<2x96xf32> to vector<2x64xf32>
    %282 = arith.addf %280, %281 : vector<2x64xf32>
    %283 = arith.negf %282 : vector<2x64xf32>
    %284 = math.exp %283 : vector<2x64xf32>
    %cst_52 = arith.constant 1.000000e+00 : f32
    %285 = vector.broadcast %cst_52 : f32 to vector<2x64xf32>
    %286 = arith.addf %285, %284 : vector<2x64xf32>
    %287 = arith.divf %285, %286 : vector<2x64xf32>
    %288 = vector.extract_strided_slice %287 {offsets = [0, 0], sizes = [2, 32], strides = [1, 1]} : vector<2x64xf32> to vector<2x32xf32>
    %289 = vector.extract_strided_slice %287 {offsets = [0, 32], sizes = [2, 32], strides = [1, 1]} : vector<2x64xf32> to vector<2x32xf32>
    %290 = vector.extract_strided_slice %277 {offsets = [0, 64], sizes = [2, 32], strides = [1, 1]} : vector<2x96xf32> to vector<2x32xf32>
    %291 = vector.extract_strided_slice %279 {offsets = [0, 64], sizes = [2, 32], strides = [1, 1]} : vector<2x96xf32> to vector<2x32xf32>
    %292 = arith.addf %291, %229 : vector<2x32xf32>
    %293 = arith.mulf %288, %292 : vector<2x32xf32>
    %294 = arith.addf %290, %293 : vector<2x32xf32>
    %295 = math.tanh %294 : vector<2x32xf32>
    %296 = arith.subf %276, %295 : vector<2x32xf32>
    %297 = arith.mulf %289, %296 : vector<2x32xf32>
    %298 = arith.addf %295, %297 : vector<2x32xf32>
    %299 = vector.extract_strided_slice %225 {offsets = [6, 0], sizes = [2, 96], strides = [1, 1]} : vector<16x96xf32> to vector<2x96xf32>
    %300 = arith.truncf %298 : vector<2x32xf32> to vector<2x32xbf16>
    %cst_53 = arith.constant dense<0.000000e+00> : vector<2x96xf32>
    %301 = tpu.matmul %300, %226, %cst_53 {dimension_numbers = #tpu.dot_dimension_numbers<[1], [0], [0], [1], [0, 0, 1, 1], [], []>} : vector<2x32xbf16>, vector<32x96xbf16>, vector<2x96xf32> -> vector<2x96xf32>
    %302 = vector.extract_strided_slice %299 {offsets = [0, 0], sizes = [2, 64], strides = [1, 1]} : vector<2x96xf32> to vector<2x64xf32>
    %303 = vector.extract_strided_slice %301 {offsets = [0, 0], sizes = [2, 64], strides = [1, 1]} : vector<2x96xf32> to vector<2x64xf32>
    %304 = arith.addf %302, %303 : vector<2x64xf32>
    %305 = arith.negf %304 : vector<2x64xf32>
    %306 = math.exp %305 : vector<2x64xf32>
    %cst_54 = arith.constant 1.000000e+00 : f32
    %307 = vector.broadcast %cst_54 : f32 to vector<2x64xf32>
    %308 = arith.addf %307, %306 : vector<2x64xf32>
    %309 = arith.divf %307, %308 : vector<2x64xf32>
    %310 = vector.extract_strided_slice %309 {offsets = [0, 0], sizes = [2, 32], strides = [1, 1]} : vector<2x64xf32> to vector<2x32xf32>
    %311 = vector.extract_strided_slice %309 {offsets = [0, 32], sizes = [2, 32], strides = [1, 1]} : vector<2x64xf32> to vector<2x32xf32>
    %312 = vector.extract_strided_slice %299 {offsets = [0, 64], sizes = [2, 32], strides = [1, 1]} : vector<2x96xf32> to vector<2x32xf32>
    %313 = vector.extract_strided_slice %301 {offsets = [0, 64], sizes = [2, 32], strides = [1, 1]} : vector<2x96xf32> to vector<2x32xf32>
    %314 = arith.addf %313, %229 : vector<2x32xf32>
    %315 = arith.mulf %310, %314 : vector<2x32xf32>
    %316 = arith.addf %312, %315 : vector<2x32xf32>
    %317 = math.tanh %316 : vector<2x32xf32>
    %318 = arith.subf %298, %317 : vector<2x32xf32>
    %319 = arith.mulf %311, %318 : vector<2x32xf32>
    %320 = arith.addf %317, %319 : vector<2x32xf32>
    %321 = vector.extract_strided_slice %225 {offsets = [8, 0], sizes = [2, 96], strides = [1, 1]} : vector<16x96xf32> to vector<2x96xf32>
    %322 = arith.truncf %320 : vector<2x32xf32> to vector<2x32xbf16>
    %cst_55 = arith.constant dense<0.000000e+00> : vector<2x96xf32>
    %323 = tpu.matmul %322, %226, %cst_55 {dimension_numbers = #tpu.dot_dimension_numbers<[1], [0], [0], [1], [0, 0, 1, 1], [], []>} : vector<2x32xbf16>, vector<32x96xbf16>, vector<2x96xf32> -> vector<2x96xf32>
    %324 = vector.extract_strided_slice %321 {offsets = [0, 0], sizes = [2, 64], strides = [1, 1]} : vector<2x96xf32> to vector<2x64xf32>
    %325 = vector.extract_strided_slice %323 {offsets = [0, 0], sizes = [2, 64], strides = [1, 1]} : vector<2x96xf32> to vector<2x64xf32>
    %326 = arith.addf %324, %325 : vector<2x64xf32>
    %327 = arith.negf %326 : vector<2x64xf32>
    %328 = math.exp %327 : vector<2x64xf32>
    %cst_56 = arith.constant 1.000000e+00 : f32
    %329 = vector.broadcast %cst_56 : f32 to vector<2x64xf32>
    %330 = arith.addf %329, %328 : vector<2x64xf32>
    %331 = arith.divf %329, %330 : vector<2x64xf32>
    %332 = vector.extract_strided_slice %331 {offsets = [0, 0], sizes = [2, 32], strides = [1, 1]} : vector<2x64xf32> to vector<2x32xf32>
    %333 = vector.extract_strided_slice %331 {offsets = [0, 32], sizes = [2, 32], strides = [1, 1]} : vector<2x64xf32> to vector<2x32xf32>
    %334 = vector.extract_strided_slice %321 {offsets = [0, 64], sizes = [2, 32], strides = [1, 1]} : vector<2x96xf32> to vector<2x32xf32>
    %335 = vector.extract_strided_slice %323 {offsets = [0, 64], sizes = [2, 32], strides = [1, 1]} : vector<2x96xf32> to vector<2x32xf32>
    %336 = arith.addf %335, %229 : vector<2x32xf32>
    %337 = arith.mulf %332, %336 : vector<2x32xf32>
    %338 = arith.addf %334, %337 : vector<2x32xf32>
    %339 = math.tanh %338 : vector<2x32xf32>
    %340 = arith.subf %320, %339 : vector<2x32xf32>
    %341 = arith.mulf %333, %340 : vector<2x32xf32>
    %342 = arith.addf %339, %341 : vector<2x32xf32>
    %343 = vector.extract_strided_slice %225 {offsets = [10, 0], sizes = [2, 96], strides = [1, 1]} : vector<16x96xf32> to vector<2x96xf32>
    %344 = arith.truncf %342 : vector<2x32xf32> to vector<2x32xbf16>
    %cst_57 = arith.constant dense<0.000000e+00> : vector<2x96xf32>
    %345 = tpu.matmul %344, %226, %cst_57 {dimension_numbers = #tpu.dot_dimension_numbers<[1], [0], [0], [1], [0, 0, 1, 1], [], []>} : vector<2x32xbf16>, vector<32x96xbf16>, vector<2x96xf32> -> vector<2x96xf32>
    %346 = vector.extract_strided_slice %343 {offsets = [0, 0], sizes = [2, 64], strides = [1, 1]} : vector<2x96xf32> to vector<2x64xf32>
    %347 = vector.extract_strided_slice %345 {offsets = [0, 0], sizes = [2, 64], strides = [1, 1]} : vector<2x96xf32> to vector<2x64xf32>
    %348 = arith.addf %346, %347 : vector<2x64xf32>
    %349 = arith.negf %348 : vector<2x64xf32>
    %350 = math.exp %349 : vector<2x64xf32>
    %cst_58 = arith.constant 1.000000e+00 : f32
    %351 = vector.broadcast %cst_58 : f32 to vector<2x64xf32>
    %352 = arith.addf %351, %350 : vector<2x64xf32>
    %353 = arith.divf %351, %352 : vector<2x64xf32>
    %354 = vector.extract_strided_slice %353 {offsets = [0, 0], sizes = [2, 32], strides = [1, 1]} : vector<2x64xf32> to vector<2x32xf32>
    %355 = vector.extract_strided_slice %353 {offsets = [0, 32], sizes = [2, 32], strides = [1, 1]} : vector<2x64xf32> to vector<2x32xf32>
    %356 = vector.extract_strided_slice %343 {offsets = [0, 64], sizes = [2, 32], strides = [1, 1]} : vector<2x96xf32> to vector<2x32xf32>
    %357 = vector.extract_strided_slice %345 {offsets = [0, 64], sizes = [2, 32], strides = [1, 1]} : vector<2x96xf32> to vector<2x32xf32>
    %358 = arith.addf %357, %229 : vector<2x32xf32>
    %359 = arith.mulf %354, %358 : vector<2x32xf32>
    %360 = arith.addf %356, %359 : vector<2x32xf32>
    %361 = math.tanh %360 : vector<2x32xf32>
    %362 = arith.subf %342, %361 : vector<2x32xf32>
    %363 = arith.mulf %355, %362 : vector<2x32xf32>
    %364 = arith.addf %361, %363 : vector<2x32xf32>
    %365 = vector.extract_strided_slice %225 {offsets = [12, 0], sizes = [2, 96], strides = [1, 1]} : vector<16x96xf32> to vector<2x96xf32>
    %366 = arith.truncf %364 : vector<2x32xf32> to vector<2x32xbf16>
    %cst_59 = arith.constant dense<0.000000e+00> : vector<2x96xf32>
    %367 = tpu.matmul %366, %226, %cst_59 {dimension_numbers = #tpu.dot_dimension_numbers<[1], [0], [0], [1], [0, 0, 1, 1], [], []>} : vector<2x32xbf16>, vector<32x96xbf16>, vector<2x96xf32> -> vector<2x96xf32>
    %368 = vector.extract_strided_slice %365 {offsets = [0, 0], sizes = [2, 64], strides = [1, 1]} : vector<2x96xf32> to vector<2x64xf32>
    %369 = vector.extract_strided_slice %367 {offsets = [0, 0], sizes = [2, 64], strides = [1, 1]} : vector<2x96xf32> to vector<2x64xf32>
    %370 = arith.addf %368, %369 : vector<2x64xf32>
    %371 = arith.negf %370 : vector<2x64xf32>
    %372 = math.exp %371 : vector<2x64xf32>
    %cst_60 = arith.constant 1.000000e+00 : f32
    %373 = vector.broadcast %cst_60 : f32 to vector<2x64xf32>
    %374 = arith.addf %373, %372 : vector<2x64xf32>
    %375 = arith.divf %373, %374 : vector<2x64xf32>
    %376 = vector.extract_strided_slice %375 {offsets = [0, 0], sizes = [2, 32], strides = [1, 1]} : vector<2x64xf32> to vector<2x32xf32>
    %377 = vector.extract_strided_slice %375 {offsets = [0, 32], sizes = [2, 32], strides = [1, 1]} : vector<2x64xf32> to vector<2x32xf32>
    %378 = vector.extract_strided_slice %365 {offsets = [0, 64], sizes = [2, 32], strides = [1, 1]} : vector<2x96xf32> to vector<2x32xf32>
    %379 = vector.extract_strided_slice %367 {offsets = [0, 64], sizes = [2, 32], strides = [1, 1]} : vector<2x96xf32> to vector<2x32xf32>
    %380 = arith.addf %379, %229 : vector<2x32xf32>
    %381 = arith.mulf %376, %380 : vector<2x32xf32>
    %382 = arith.addf %378, %381 : vector<2x32xf32>
    %383 = math.tanh %382 : vector<2x32xf32>
    %384 = arith.subf %364, %383 : vector<2x32xf32>
    %385 = arith.mulf %377, %384 : vector<2x32xf32>
    %386 = arith.addf %383, %385 : vector<2x32xf32>
    %387 = vector.extract_strided_slice %225 {offsets = [14, 0], sizes = [2, 96], strides = [1, 1]} : vector<16x96xf32> to vector<2x96xf32>
    %388 = arith.truncf %386 : vector<2x32xf32> to vector<2x32xbf16>
    %cst_61 = arith.constant dense<0.000000e+00> : vector<2x96xf32>
    %389 = tpu.matmul %388, %226, %cst_61 {dimension_numbers = #tpu.dot_dimension_numbers<[1], [0], [0], [1], [0, 0, 1, 1], [], []>} : vector<2x32xbf16>, vector<32x96xbf16>, vector<2x96xf32> -> vector<2x96xf32>
    %390 = vector.extract_strided_slice %387 {offsets = [0, 0], sizes = [2, 64], strides = [1, 1]} : vector<2x96xf32> to vector<2x64xf32>
    %391 = vector.extract_strided_slice %389 {offsets = [0, 0], sizes = [2, 64], strides = [1, 1]} : vector<2x96xf32> to vector<2x64xf32>
    %392 = arith.addf %390, %391 : vector<2x64xf32>
    %393 = arith.negf %392 : vector<2x64xf32>
    %394 = math.exp %393 : vector<2x64xf32>
    %cst_62 = arith.constant 1.000000e+00 : f32
    %395 = vector.broadcast %cst_62 : f32 to vector<2x64xf32>
    %396 = arith.addf %395, %394 : vector<2x64xf32>
    %397 = arith.divf %395, %396 : vector<2x64xf32>
    %398 = vector.extract_strided_slice %397 {offsets = [0, 0], sizes = [2, 32], strides = [1, 1]} : vector<2x64xf32> to vector<2x32xf32>
    %399 = vector.extract_strided_slice %397 {offsets = [0, 32], sizes = [2, 32], strides = [1, 1]} : vector<2x64xf32> to vector<2x32xf32>
    %400 = vector.extract_strided_slice %387 {offsets = [0, 64], sizes = [2, 32], strides = [1, 1]} : vector<2x96xf32> to vector<2x32xf32>
    %401 = vector.extract_strided_slice %389 {offsets = [0, 64], sizes = [2, 32], strides = [1, 1]} : vector<2x96xf32> to vector<2x32xf32>
    %402 = arith.addf %401, %229 : vector<2x32xf32>
    %403 = arith.mulf %398, %402 : vector<2x32xf32>
    %404 = arith.addf %400, %403 : vector<2x32xf32>
    %405 = math.tanh %404 : vector<2x32xf32>
    %406 = arith.subf %386, %405 : vector<2x32xf32>
    %407 = arith.mulf %399, %406 : vector<2x32xf32>
    %408 = arith.addf %405, %407 : vector<2x32xf32>
    %409 = arith.truncf %408 : vector<2x32xf32> to vector<2x32xbf16>
    %c128 = arith.constant 128 : index
    %c0_63 = arith.constant 0 : index
    %410 = vector.load %arg2[%c128, %c0_63] : memref<160x96xbf16, #tpu.memory_space<vmem>>, vector<32x32xbf16>
    %cst_64 = arith.constant dense<0.000000e+00> : vector<2x32xf32>
    %411 = tpu.matmul %409, %410, %cst_64 {dimension_numbers = #tpu.dot_dimension_numbers<[1], [0], [0], [1], [0, 0, 1, 1], [], []>} : vector<2x32xbf16>, vector<32x32xbf16>, vector<2x32xf32> -> vector<2x32xf32>
    %c6_65 = arith.constant 6 : index
    %c0_66 = arith.constant 0 : index
    %412 = vector.load %arg3[%c6_65, %c0_66] : memref<7x96xf32, #tpu.memory_space<vmem>>, vector<1x32xf32>
    %413 = vector.broadcast %412 : vector<1x32xf32> to vector<2x32xf32>
    %414 = arith.addf %411, %413 : vector<2x32xf32>
    %415 = vector.extract_strided_slice %414 {offsets = [0, 0], sizes = [2, 16], strides = [1, 1]} : vector<2x32xf32> to vector<2x16xf32>
    %c0_67 = arith.constant 0 : index
    %c0_68 = arith.constant 0 : index
    %416 = vector.load %arg4[%c0_67, %c0_68] : memref<2x16xf32, #tpu.memory_space<vmem>>, vector<2x16xf32>
    tpu.vector_store %arg4[%c0_67, %c0_68], %415 {strides = array<i32>} : memref<2x16xf32, #tpu.memory_space<vmem>>, vector<2x16xf32>,
    %417 = vector.extract_strided_slice %414 {offsets = [0, 16], sizes = [2, 16], strides = [1, 1]} : vector<2x32xf32> to vector<2x16xf32>
    %c0_69 = arith.constant 0 : index
    %c0_70 = arith.constant 0 : index
    %418 = vector.load %arg5[%c0_69, %c0_70] : memref<2x16xf32, #tpu.memory_space<vmem>>, vector<2x16xf32>
    tpu.vector_store %arg5[%c0_69, %c0_70], %417 {strides = array<i32>} : memref<2x16xf32, #tpu.memory_space<vmem>>, vector<2x16xf32>,
    return
  }
}

</mosaic_0001>

<bundles_post_ra>
// kernel: fwd.1
= control target key start
LH: loop header
LB: loop body
LE: loop exit
PB: predicated region body
PF: predicated region fallthrough
CT: control target
= control target key end

     0   :  { %11 = vsyncpa [#allocation4], 0  ;;  %s2121_s0 = inlined_call_operand.hbm [shape: f32[16,16], index: 0, kind: input, shape index: {}]   ;;  %s2122_s1 = inlined_call_operand.hbm [shape: f32[16,16], index: 1, kind: input, shape index: {}]   ;;  %s2123_s2 = inlined_call_operand.hbm [shape: bf16[160,96], index: 2, kind: input, shape index: {}]   ;;  %s2124_s3 = inlined_call_operand.hbm [shape: f32[7,96], index: 3, kind: input, shape index: {}]   ;;  %s2125_s4 = inlined_call_operand.hbm [shape: f32[2,16], index: 4, kind: output, shape index: {0}]   ;;  %s2126_s5 = inlined_call_operand.hbm [shape: f32[2,16], index: 5, kind: output, shape index: {1}]  }
   0x1   :  { %12 = vsyncpa [#allocation7], 0 }
   0x2   :  { %13 = vsyncpa [#allocation10], 0 }
   0x3   :  { %14 = vsyncpa [#allocation5], 0 }
   0x4   :  { %15 = vsyncpa [#allocation13], 0  ;;  %s33_s20 = sshll.u32 %s2122_s1, 4  ;;  %s1815_s21 = smov [#allocation6]   ;;  %s34_s20 = int_to_ptr.hbm [resolvable:$true] %s33_s20 }
   0x5   :  { %s35_s22 = sshll.u32 %s1815_s21, 4  ;;  %s20_s25 = sshll.u32 %s2121_s0, 4  ;;  %s36_s22 = int_to_ptr.vmem [resolvable:$true] %s35_s22  ;;  %s21_s25 = int_to_ptr.hbm [resolvable:$true] %s20_s25 }
   0x6   :  { %s1816_s26 = smov 128   ;;  %s1817_s27 = smov 8  }
   0x7   :  { %41 = dma.hbm_to_vmem [thread:$0]  %s34_s20, 256, %s36_s22, [#allocation7], %s1816_s26, %s1816_s26, %s1817_s27  }
   0x8   :  { %s1818_s28 = smov [#allocation3]   ;;  %s46_s7 = sshll.u32 %s2123_s2, 4  ;;  %s47_s7 = int_to_ptr.hbm [resolvable:$true] %s46_s7 }
   0x9   :  { %s22_s29 = sshll.u32 %s1818_s28, 4  ;;  %s1819_s1 = smov [#allocation8]   ;;  %s23_s29 = int_to_ptr.vmem [resolvable:$true] %s22_s29 }
   0xa   :  { %28 = dma.hbm_to_vmem [thread:$0]  %s21_s25, 256, %s23_s29, [#allocation4], %s1816_s26, %s1816_s26, %s1817_s27  }
   0xb   :  { %s48_s8 = sshll.u32 %s1819_s1, 4  ;;  %s60_s0 = sshll.u32 %s2124_s3, 4  ;;  %s49_s8 = int_to_ptr.vmem [resolvable:$true] %s48_s8  ;;  %s61_s0 = int_to_ptr.hbm [resolvable:$true] %s60_s0 }
   0xc   :  { %s1820_s11 = smov 64   ;;  %s1821_s12 = smov 4  }
   0xd   :  { %54 = dma.hbm_to_vmem [thread:$0]  %s47_s7, 1280, %s49_s8, [#allocation7], %s1820_s11, %s1820_s11, %s1821_s12  }
   0xe   :  { %s1822_s13 = smov [#allocation9]  }
   0xf   :  { %s62_s14 = sshll.u32 %s1822_s13, 4  ;;  %s63_s14 = int_to_ptr.vmem [resolvable:$true] %s62_s14 }
  0x10   :  { %65 = dma.hbm_to_vmem [thread:$0]  %s61_s0, 128, %s63_s14, [#allocation10]  }
  0x11   :  { %1805 = dma.done.wait [#allocation4], 256  }
  0x12   :  { %1806 = vsyncadd [#allocation4], 4294967040 }
  0x13   :  { %1807 = dma.done.wait [#allocation7], 1536  }
  0x14   :  { %1808 = vsyncadd [#allocation7], 4294965760 }
  0x15   :  { %1809 = dma.done.wait [#allocation10], 128  }
  0x16   :  { %1810 = vsyncadd [#allocation10], 4294967168  ;;  %v1536_v0 = vld [vmem:[#allocation8 + $0x8] sm:$0xff]  ;;  %v1535_v1 = vld [vmem:[#allocation8] sm:$0xff]  ;;  %vm100_vm0 = vcmask 130048   ;;  %vm170_vm1 = vcmask 261120  }
  0x17   :  { %v1538_v2 = vld [vmem:[#allocation8 + $0x18] sm:$0xff]  ;;  %v86_v3 = vld [vmem:[#allocation6] sm:$0xff]  ;;  %v83_v5 = vld [vmem:[#allocation3] sm:$0xff]  ;;  %111 = vmatpush.bf16.msra.mxu0 %v1536_v0  ;;  %134 = vmatpush.bf16.msra.mxu1 %v1535_v1  ;;  %vm155_vm2 = vcmask 1040384   ;;  %s1823_s2 = smov 32   ;;  %s1824_s3 = smov 96  }
  0x18   :  { %v87_v4 = vld [vmem:[#allocation6 + $0x8] sm:$0xff]  ;;  %v84_v7 = vld [vmem:[#allocation3 + $0x8] sm:$0xff]  ;;  %v1537_v8 = vld [vmem:[#allocation8 + $0x10] sm:$0xff]  ;;  %180 = vmatpush.bf16.msra.mxu2 %v1538_v2  ;;  %261 = vmatpush.bf16.msra.mxu3 %v1538_v2  ;;  %s1825_s15 = smov [#allocation11]   ;;  %s1431_s19 = sshll.u32 %s2125_s4, 4  ;;  %s1432_s19 = int_to_ptr.hbm [resolvable:$true] %s1431_s19 }
  0x19   :  { %v88_v6 = vpack.c.bf16 %v87_v4, %v86_v3  ;;  %v85_v9 = vpack.c.bf16 %v84_v7, %v83_v5  ;;  %v1872_v10 = vld [vmem:[#allocation9 + $0x4] ss:$0 sm:$0xff]  ;;  %v1559_v11 = vld [vmem:[#allocation9 + $0x1] ss:$0 sm:$0xff]  ;;  %v1560_v22 = vld [vmem:[#allocation9] ss:$0 sm:$0xff] }
  0x1a   :  { %v157_v12 = vpack.c.bf16 %v1872_v10, %v1872_v10  ;;  %208 = vrot.lane.b32.xlu0 %v1559_v11, %s1820_s11  ;;  %s1429_s16 = sshll.u32 %s1825_s15, 4  ;;  %s1826_s20 = smov 112   ;;  %s1430_s16 = int_to_ptr.vmem [resolvable:$true] %s1429_s16 }
  0x1b   :  { %334 = vmatpush.bf16.msrb.mxu0 %v1538_v2  ;;  %407 = vmatpush.bf16.msrb.mxu1 %v1538_v2  ;;  %s1827_s21 = smov [#allocation12]   ;;  %s1442_s25 = sshll.u32 %s2126_s5, 4  ;;  %s1443_s25 = int_to_ptr.hbm [resolvable:$true] %s1442_s25 }
  0x1c   :  { %1463 = vmatmul.msk.bf16.vlgmr.msra.gmra.mxu0 %vm100_vm0, %v88_v6  ;;  %1468 = vmatmul.msk.bf16.vlgmr.msra.gmra.mxu1 %vm100_vm0, %v85_v9  ;;  %s1440_s22 = sshll.u32 %s1827_s21, 4  ;;  %s1441_s22 = int_to_ptr.vmem [resolvable:$true] %s1440_s22 }
  0x1d   :  { %181 = vmatpush.bf16.msra.mxu2 %v1537_v8  ;;  %262 = vmatpush.bf16.msra.mxu3 %v1537_v8 }
  0x1f   :  { %335 = vmatpush.bf16.msrb.mxu0 %v1537_v8  ;;  %408 = vmatpush.bf16.msrb.mxu1 %v1537_v8 }
  0x20   :  { %1477 = vmatmul.msk.bf16.vlgmr.msra.gmra.mxu2 %vm170_vm1, %v157_v12 }
  0x21   :  { %480 = vmatpush.bf16.msrb.mxu2 %v1538_v2  ;;  %553 = vmatpush.bf16.msrb.mxu3 %v1538_v2 }
  0x23   :  { %626 = vmatpush.bf16.msra.mxu0 %v1538_v2  ;;  %699 = vmatpush.bf16.msra.mxu1 %v1538_v2 }
  0x25   :  { %481 = vmatpush.bf16.msrb.mxu2 %v1537_v8  ;;  %554 = vmatpush.bf16.msrb.mxu3 %v1537_v8 }
  0x27   :  { %627 = vmatpush.bf16.msra.mxu0 %v1537_v8  ;;  %700 = vmatpush.bf16.msra.mxu1 %v1537_v8 }
  0x8c   :  { %v1878_v13 = vpop.permute.xlu0 %208 }
  0x99   :  { %v113_v17 = vpop.f32.mrf.mxu0  ;;  %v136_v18 = vpop.f32.mrf.mxu1 }
  0x9a   :  { %v137_v21 = vadd.f32 %v136_v18, %v113_v17 }
  0x9c   :  { %v142_v24 = vadd.f32 %v1560_v22, %v137_v21 }
  0x9e   :  { %v245_v26 = vrot.slane %v142_v24, 1  ;;  %v316_v28 = vrot.slane %v142_v24, 2  ;;  %v389_v30 = vrot.slane %v142_v24, 3  ;;  %v462_v32 = vrot.slane %v142_v24, 4 }
  0x9f   :  { %v535_v34 = vrot.slane %v142_v24, 5  ;;  %v608_v37 = vrot.slane %v142_v24, 6  ;;  %v681_v41 = vrot.slane %v142_v24, 7 }
  0xa1   :  { %v115_v19 = vpop.f32.mrf.mxu0  ;;  %v138_v20 = vpop.f32.mrf.mxu1 }
  0xa2   :  { %v139_v23 = vadd.f32 %v138_v20, %v115_v19 }
  0xa3   :  { %v183_v14 = vpop.f32.mrf.mxu2 }
  0xa4   :  { %v211_v15 = vadd.f32 %v1878_v13, %v183_v14  ;;  %v143_v25 = vadd.f32 %v1560_v22, %v139_v23 }
  0xa6   :  { %213 = vrot.lane.b32.xlu0 %v211_v15, %s1820_s11  ;;  %v1883_v27 = vsel %vm155_vm2, %v245_v26, %v143_v25  ;;  %v318_v29 = vrot.slane %v143_v25, 1  ;;  %v391_v31 = vrot.slane %v143_v25, 2  ;;  %v464_v33 = vrot.slane %v143_v25, 3 }
  0xa7   :  { %v537_v36 = vrot.slane %v143_v25, 4  ;;  %v610_v38 = vrot.slane %v143_v25, 5  ;;  %v683_v42 = vrot.slane %v143_v25, 6  ;;  %v153_v46 = vrot.slane %v143_v25, 7 }
  0xa8   :  { %v1886_v35 = vsel %vm155_vm2, %v316_v28, %v318_v29  ;;  %v1889_v39 = vsel %vm155_vm2, %v389_v30, %v391_v31  ;;  %v1892_v40 = vsel %vm155_vm2, %v462_v32, %v464_v33 }
  0xa9   :  { %v1895_v43 = vsel %vm155_vm2, %v535_v34, %v537_v36  ;;  %v1898_v44 = vsel %vm155_vm2, %v608_v37, %v610_v38  ;;  %v1901_v45 = vsel %vm155_vm2, %v681_v41, %v683_v42  ;;  %v156_v47 = vsel %vm155_vm2, %v142_v24, %v153_v46 }
  0xaa   :  { %v187_v48 = vadd.f32 %v183_v14, %v156_v47 }
  0xab   :  { %v185_v16 = vpop.f32.mrf.mxu2 }
  0xac   :  { %v1478_v49 = vmul.f32 -1.442695, %v187_v48 }
  0xae   :  { %1565 = vpow2.f32 %v1478_v49 }
  0xb4   :  { %v1566_v50 = vpop.eup %1565 }
  0xb5   :  { %v191_v51 = vadd.f32 1.0, %v1566_v50 }
  0xb7   :  { %1567 = vrcp.f32 %v191_v51  ;;  %v203_v57 = vand.u32 2147483648, %v191_v51  ;;  %vm197_vm4 = vweird.f32 %v191_v51  ;;  %v201_v58 = vand.u32 2147483647, %v191_v51 }
  0xb9   :  { %v204_v60 = vor.u32 1.1754944e-38, %v203_v57  ;;  %vm202_vm6 = vcmp.eq.f32.partialorder %v201_v58, 8.507059e+37 }
  0xbd   :  { %v1568_v52 = vpop.eup %1567 }
  0xbe   :  { %v193_v53 = vmul.f32 %v1568_v52, %v191_v51  ;;  %vm198_vm3 = vweird.f32 %v1568_v52 }
  0xbf   :  { %vm199_vm5 = vmor %vm197_vm4, %vm198_vm3 }
  0xc0   :  { %v194_v54 = vsub.f32 1.0, %v193_v53 }
  0xc2   :  { %v195_v55 = vmul.f32 %v1568_v52, %v194_v54 }
  0xc4   :  { %v196_v56 = vadd.f32 %v1568_v52, %v195_v55 }
  0xc6   :  { %v200_v59 = vsel %vm199_vm5, %v1568_v52, %v196_v56 }
  0xc7   :  { %v205_v62 = vsel %vm202_vm6, %v204_v60, %v200_v59 }
 0x118   :  { %v214_v61 = vpop.permute.xlu0 %213 }
 0x119   :  { %v216_v63 = vmul.f32 %v214_v61, %v205_v62 }
 0x11b   :  { %218 = vrot.lane.b32.xlu1 %v216_v63, %s1820_s11 }
 0x18d   :  { %v219_v0 = vpop.permute.xlu1 %218 }
 0x18e   :  { %v221_v1 = vadd.f32 %v219_v0, %v156_v47 }
 0x190   :  { %1569 = vtanh.f32 %v221_v1 }
 0x196   :  { %v1570_v2 = vpop.eup %1569 }
 0x197   :  { %224 = vrot.lane.b32.xlu1 %v1570_v2, %s1820_s11 }
 0x209   :  { %v225_v3 = vpop.permute.xlu1 %224 }
 0x20a   :  { %v227_v4 = vsub.f32 %v1872_v10, %v225_v3 }
 0x20c   :  { %229 = vrot.lane.b32.xlu2 %v227_v4, %s1823_s2 }
 0x266   :  { %v230_v5 = vpop.permute.xlu2 %229 }
 0x267   :  { %v232_v6 = vmul.f32 %v230_v5, %v205_v62 }
 0x269   :  { %234 = vrot.lane.b32.xlu2 %v232_v6, %s1823_s2 }
 0x2c3   :  { %v235_v7 = vpop.permute.xlu2 %234 }
 0x2c4   :  { %v1909_v8 = vadd.f32 %v1570_v2, %v235_v7 }
 0x2c6   :  { %v248_v9 = vpack.c.bf16 %v1909_v8, %v1909_v8 }
 0x2c8   :  { %250 = vrot.lane.b32.xlu0 %v248_v9, %s1820_s11 }
 0x33a   :  { %v251_v11 = vpop.permute.xlu0 %250 }
 0x33b   :  { %1479 = vmatmul.msk.bf16.vlgmr.msra.gmra.mxu3 %vm170_vm1, %v251_v11 }
 0x3be   :  { %v264_v12 = vpop.f32.mrf.mxu3 }
 0x3bf   :  { %v288_v10 = vadd.f32 %v264_v12, %v1878_v13  ;;  %v268_v15 = vadd.f32 %v264_v12, %v1883_v27 }
 0x3c1   :  { %290 = vrot.lane.b32.xlu1 %v288_v10, %s1820_s11  ;;  %v1480_v16 = vmul.f32 -1.442695, %v268_v15 }
 0x3c3   :  { %1571 = vpow2.f32 %v1480_v16 }
 0x3c6   :  { %v266_v14 = vpop.f32.mrf.mxu3 }
 0x3c9   :  { %v1572_v17 = vpop.eup %1571 }
 0x3ca   :  { %v272_v18 = vadd.f32 1.0, %v1572_v17 }
 0x3cc   :  { %1573 = vrcp.f32 %v272_v18  ;;  %v284_v24 = vand.u32 2147483648, %v272_v18  ;;  %vm278_vm8 = vweird.f32 %v272_v18  ;;  %v282_v25 = vand.u32 2147483647, %v272_v18 }
 0x3ce   :  { %v285_v28 = vor.u32 1.1754944e-38, %v284_v24  ;;  %vm283_vm10 = vcmp.eq.f32.partialorder %v282_v25, 8.507059e+37 }
 0x3d2   :  { %v1574_v19 = vpop.eup %1573 }
 0x3d3   :  { %v274_v20 = vmul.f32 %v1574_v19, %v272_v18  ;;  %vm279_vm7 = vweird.f32 %v1574_v19 }
 0x3d4   :  { %vm280_vm9 = vmor %vm278_vm8, %vm279_vm7 }
 0x3d5   :  { %v275_v21 = vsub.f32 1.0, %v274_v20 }
 0x3d7   :  { %v276_v22 = vmul.f32 %v1574_v19, %v275_v21 }
 0x3d9   :  { %v277_v23 = vadd.f32 %v1574_v19, %v276_v22 }
 0x3db   :  { %v281_v26 = vsel %vm280_vm9, %v1574_v19, %v277_v23 }
 0x3dc   :  { %v286_v30 = vsel %vm283_vm10, %v285_v28, %v281_v26 }
 0x433   :  { %v291_v29 = vpop.permute.xlu1 %290 }
 0x434   :  { %v293_v31 = vmul.f32 %v291_v29, %v286_v30 }
 0x436   :  { %295 = vrot.lane.b32.xlu2 %v293_v31, %s1820_s11 }
 0x490   :  { %v296_v32 = vpop.permute.xlu2 %295 }
 0x491   :  { %v298_v33 = vadd.f32 %v296_v32, %v1883_v27 }
 0x493   :  { %1575 = vtanh.f32 %v298_v33 }
 0x499   :  { %v1576_v34 = vpop.eup %1575 }
 0x49a   :  { %v300_v36 = vsub.f32 %v1909_v8, %v1576_v34 }
 0x49c   :  { %302 = vrot.lane.b32.xlu0 %v300_v36, %s1824_s3 }
 0x50e   :  { %v303_v37 = vpop.permute.xlu0 %302 }
 0x50f   :  { %v305_v38 = vmul.f32 %v303_v37, %v286_v30 }
 0x511   :  { %307 = vrot.lane.b32.xlu1 %v305_v38, %s1823_s2 }
 0x583   :  { %v308_v41 = vpop.permute.xlu1 %307 }
 0x584   :  { %v1923_v42 = vadd.f32 %v1576_v34, %v308_v41 }
 0x586   :  { %v321_v46 = vpack.c.bf16 %v1923_v42, %v1923_v42 }
 0x588   :  { %323 = vrot.lane.b32.xlu2 %v321_v46, %s1820_s11 }
 0x5e2   :  { %v324_v27 = vpop.permute.xlu2 %323 }
 0x5e3   :  { %1481 = vmatmul.msk.bf16.vlgmr.msrb.gmra.mxu0 %vm170_vm1, %v324_v27 }
 0x660   :  { %v337_v47 = vpop.f32.mrf.mxu0 }
 0x661   :  { %v361_v48 = vadd.f32 %v337_v47, %v1878_v13  ;;  %v341_v50 = vadd.f32 %v337_v47, %v1886_v35 }
 0x663   :  { %363 = vrot.lane.b32.xlu0 %v361_v48, %s1820_s11  ;;  %v1482_v51 = vmul.f32 -1.442695, %v341_v50 }
 0x665   :  { %1577 = vpow2.f32 %v1482_v51 }
 0x668   :  { %v339_v49 = vpop.f32.mrf.mxu0 }
 0x66b   :  { %v1578_v52 = vpop.eup %1577 }
 0x66c   :  { %v345_v53 = vadd.f32 1.0, %v1578_v52 }
 0x66e   :  { %1579 = vrcp.f32 %v345_v53  ;;  %v357_v59 = vand.u32 2147483648, %v345_v53  ;;  %vm351_vm12 = vweird.f32 %v345_v53  ;;  %v355_v60 = vand.u32 2147483647, %v345_v53 }
 0x670   :  { %v358_v62 = vor.u32 1.1754944e-38, %v357_v59  ;;  %vm356_vm14 = vcmp.eq.f32.partialorder %v355_v60, 8.507059e+37 }
 0x674   :  { %v1580_v54 = vpop.eup %1579 }
 0x675   :  { %v347_v55 = vmul.f32 %v1580_v54, %v345_v53  ;;  %vm352_vm11 = vweird.f32 %v1580_v54 }
 0x676   :  { %vm353_vm13 = vmor %vm351_vm12, %vm352_vm11 }
 0x677   :  { %v348_v56 = vsub.f32 1.0, %v347_v55 }
 0x679   :  { %v349_v57 = vmul.f32 %v1580_v54, %v348_v56 }
 0x67b   :  { %v350_v58 = vadd.f32 %v1580_v54, %v349_v57 }
 0x67d   :  { %v354_v61 = vsel %vm353_vm13, %v1580_v54, %v350_v58 }
 0x67e   :  { %v359_v0 = vsel %vm356_vm14, %v358_v62, %v354_v61 }
 0x6d5   :  { %v364_v63 = vpop.permute.xlu0 %363 }
 0x6d6   :  { %v366_v1 = vmul.f32 %v364_v63, %v359_v0 }
 0x6d8   :  { %368 = vrot.lane.b32.xlu1 %v366_v1, %s1820_s11 }
 0x74a   :  { %v369_v2 = vpop.permute.xlu1 %368 }
 0x74b   :  { %v371_v3 = vadd.f32 %v369_v2, %v1886_v35 }
 0x74d   :  { %1581 = vtanh.f32 %v371_v3 }
 0x753   :  { %v1582_v4 = vpop.eup %1581 }
 0x754   :  { %v373_v5 = vsub.f32 %v1923_v42, %v1582_v4 }
 0x756   :  { %375 = vrot.lane.b32.xlu2 %v373_v5, %s1824_s3 }
 0x7b0   :  { %v376_v6 = vpop.permute.xlu2 %375 }
 0x7b1   :  { %v378_v7 = vmul.f32 %v376_v6, %v359_v0 }
 0x7b3   :  { %380 = vrot.lane.b32.xlu0 %v378_v7, %s1823_s2 }
 0x825   :  { %v381_v9 = vpop.permute.xlu0 %380 }
 0x826   :  { %v1937_v11 = vadd.f32 %v1582_v4, %v381_v9 }
 0x828   :  { %v394_v12 = vpack.c.bf16 %v1937_v11, %v1937_v11 }
 0x82a   :  { %396 = vrot.lane.b32.xlu1 %v394_v12, %s1820_s11 }
 0x89c   :  { %v397_v10 = vpop.permute.xlu1 %396 }
 0x89d   :  { %1483 = vmatmul.msk.bf16.vlgmr.msrb.gmra.mxu1 %vm170_vm1, %v397_v10 }
 0x91a   :  { %v410_v35 = vpop.f32.mrf.mxu1 }
 0x91b   :  { %v434_v14 = vadd.f32 %v410_v35, %v1878_v13  ;;  %v414_v16 = vadd.f32 %v410_v35, %v1889_v39 }
 0x91d   :  { %436 = vrot.lane.b32.xlu2 %v434_v14, %s1820_s11  ;;  %v1484_v17 = vmul.f32 -1.442695, %v414_v16 }
 0x91f   :  { %1583 = vpow2.f32 %v1484_v17 }
 0x922   :  { %v412_v15 = vpop.f32.mrf.mxu1 }
 0x925   :  { %v1584_v18 = vpop.eup %1583 }
 0x926   :  { %v418_v19 = vadd.f32 1.0, %v1584_v18 }
 0x928   :  { %1585 = vrcp.f32 %v418_v19  ;;  %v430_v25 = vand.u32 2147483648, %v418_v19  ;;  %vm424_vm0 = vweird.f32 %v418_v19  ;;  %v428_v26 = vand.u32 2147483647, %v418_v19 }
 0x92a   :  { %v431_v29 = vor.u32 1.1754944e-38, %v430_v25  ;;  %vm429_vm3 = vcmp.eq.f32.partialorder %v428_v26, 8.507059e+37 }
 0x92e   :  { %v1586_v20 = vpop.eup %1585 }
 0x92f   :  { %v420_v21 = vmul.f32 %v1586_v20, %v418_v19  ;;  %vm425_vm15 = vweird.f32 %v1586_v20 }
 0x930   :  { %vm426_vm2 = vmor %vm424_vm0, %vm425_vm15 }
 0x931   :  { %v421_v22 = vsub.f32 1.0, %v420_v21 }
 0x933   :  { %v422_v23 = vmul.f32 %v1586_v20, %v421_v22 }
 0x935   :  { %v423_v24 = vadd.f32 %v1586_v20, %v422_v23 }
 0x937   :  { %v427_v28 = vsel %vm426_vm2, %v1586_v20, %v423_v24 }
 0x938   :  { %v432_v31 = vsel %vm429_vm3, %v431_v29, %v427_v28 }
 0x977   :  { %v437_v30 = vpop.permute.xlu2 %436 }
 0x978   :  { %v439_v32 = vmul.f32 %v437_v30, %v432_v31 }
 0x97a   :  { %441 = vrot.lane.b32.xlu0 %v439_v32, %s1820_s11 }
 0x9ec   :  { %v442_v33 = vpop.permute.xlu0 %441 }
 0x9ed   :  { %v444_v34 = vadd.f32 %v442_v33, %v1889_v39 }
 0x9ef   :  { %1587 = vtanh.f32 %v444_v34 }
 0x9f5   :  { %v1588_v36 = vpop.eup %1587 }
 0x9f6   :  { %v446_v37 = vsub.f32 %v1937_v11, %v1588_v36 }
 0x9f8   :  { %448 = vrot.lane.b32.xlu1 %v446_v37, %s1824_s3 }
 0xa6a   :  { %v449_v38 = vpop.permute.xlu1 %448 }
 0xa6b   :  { %v451_v41 = vmul.f32 %v449_v38, %v432_v31 }
 0xa6d   :  { %453 = vrot.lane.b32.xlu2 %v451_v41, %s1823_s2 }
 0xac7   :  { %v454_v46 = vpop.permute.xlu2 %453 }
 0xac8   :  { %v1951_v27 = vadd.f32 %v1588_v36, %v454_v46 }
 0xaca   :  { %v467_v47 = vpack.c.bf16 %v1951_v27, %v1951_v27 }
 0xacc   :  { %469 = vrot.lane.b32.xlu0 %v467_v47, %s1820_s11 }
 0xb3e   :  { %v470_v48 = vpop.permute.xlu0 %469 }
 0xb3f   :  { %1485 = vmatmul.msk.bf16.vlgmr.msrb.gmra.mxu2 %vm170_vm1, %v470_v48 }
 0xbc2   :  { %v483_v39 = vpop.f32.mrf.mxu2 }
 0xbc3   :  { %v507_v49 = vadd.f32 %v483_v39, %v1878_v13  ;;  %v487_v51 = vadd.f32 %v483_v39, %v1892_v40 }
 0xbc5   :  { %509 = vrot.lane.b32.xlu1 %v507_v49, %s1820_s11  ;;  %v1486_v52 = vmul.f32 -1.442695, %v487_v51 }
 0xbc7   :  { %1589 = vpow2.f32 %v1486_v52 }
 0xbca   :  { %v485_v50 = vpop.f32.mrf.mxu2 }
 0xbcd   :  { %v1590_v53 = vpop.eup %1589 }
 0xbce   :  { %v491_v54 = vadd.f32 1.0, %v1590_v53 }
 0xbd0   :  { %1591 = vrcp.f32 %v491_v54  ;;  %v503_v60 = vand.u32 2147483648, %v491_v54  ;;  %vm497_vm5 = vweird.f32 %v491_v54  ;;  %v501_v61 = vand.u32 2147483647, %v491_v54 }
 0xbd2   :  { %v504_v63 = vor.u32 1.1754944e-38, %v503_v60  ;;  %vm502_vm7 = vcmp.eq.f32.partialorder %v501_v61, 8.507059e+37 }
 0xbd6   :  { %v1592_v55 = vpop.eup %1591 }
 0xbd7   :  { %v493_v56 = vmul.f32 %v1592_v55, %v491_v54  ;;  %vm498_vm4 = vweird.f32 %v1592_v55 }
 0xbd8   :  { %vm499_vm6 = vmor %vm497_vm5, %vm498_vm4  ;;  %vm242_vm5 = vcmask 254976  }
 0xbd9   :  { %v494_v57 = vsub.f32 1.0, %v493_v56 }
 0xbdb   :  { %v495_v58 = vmul.f32 %v1592_v55, %v494_v57 }
 0xbdd   :  { %v496_v59 = vadd.f32 %v1592_v55, %v495_v58 }
 0xbdf   :  { %v500_v62 = vsel %vm499_vm6, %v1592_v55, %v496_v59 }
 0xbe0   :  { %v505_v1 = vsel %vm502_vm7, %v504_v63, %v500_v62 }
 0xc37   :  { %v510_v0 = vpop.permute.xlu1 %509 }
 0xc38   :  { %v512_v2 = vmul.f32 %v510_v0, %v505_v1 }
 0xc3a   :  { %514 = vrot.lane.b32.xlu2 %v512_v2, %s1820_s11 }
 0xc94   :  { %v515_v3 = vpop.permute.xlu2 %514 }
 0xc95   :  { %v517_v4 = vadd.f32 %v515_v3, %v1892_v40 }
 0xc97   :  { %1593 = vtanh.f32 %v517_v4 }
 0xc9d   :  { %v1594_v5 = vpop.eup %1593 }
 0xc9e   :  { %v519_v6 = vsub.f32 %v1951_v27, %v1594_v5 }
 0xca0   :  { %521 = vrot.lane.b32.xlu0 %v519_v6, %s1824_s3 }
 0xd12   :  { %v522_v7 = vpop.permute.xlu0 %521 }
 0xd13   :  { %v524_v9 = vmul.f32 %v522_v7, %v505_v1 }
 0xd15   :  { %526 = vrot.lane.b32.xlu1 %v524_v9, %s1823_s2 }
 0xd87   :  { %v527_v12 = vpop.permute.xlu1 %526 }
 0xd88   :  { %v1965_v10 = vadd.f32 %v1594_v5, %v527_v12 }
 0xd8a   :  { %v540_v35 = vpack.c.bf16 %v1965_v10, %v1965_v10 }
 0xd8c   :  { %542 = vrot.lane.b32.xlu2 %v540_v35, %s1820_s11 }
 0xde6   :  { %v543_v14 = vpop.permute.xlu2 %542 }
 0xde7   :  { %1487 = vmatmul.msk.bf16.vlgmr.msrb.gmra.mxu3 %vm170_vm1, %v543_v14 }
 0xe6a   :  { %v556_v40 = vpop.f32.mrf.mxu3 }
 0xe6b   :  { %v580_v15 = vadd.f32 %v556_v40, %v1878_v13  ;;  %v560_v17 = vadd.f32 %v556_v40, %v1895_v43 }
 0xe6d   :  { %582 = vrot.lane.b32.xlu0 %v580_v15, %s1820_s11  ;;  %v1488_v18 = vmul.f32 -1.442695, %v560_v17 }
 0xe6f   :  { %1595 = vpow2.f32 %v1488_v18 }
 0xe72   :  { %v558_v16 = vpop.f32.mrf.mxu3 }
 0xe75   :  { %v1596_v19 = vpop.eup %1595 }
 0xe76   :  { %v564_v20 = vadd.f32 1.0, %v1596_v19 }
 0xe78   :  { %1597 = vrcp.f32 %v564_v20  ;;  %v576_v26 = vand.u32 2147483648, %v564_v20  ;;  %vm570_vm9 = vweird.f32 %v564_v20  ;;  %v574_v28 = vand.u32 2147483647, %v564_v20 }
 0xe7a   :  { %v577_v30 = vor.u32 1.1754944e-38, %v576_v26  ;;  %vm575_vm11 = vcmp.eq.f32.partialorder %v574_v28, 8.507059e+37 }
 0xe7e   :  { %v1598_v21 = vpop.eup %1597 }
 0xe7f   :  { %v566_v22 = vmul.f32 %v1598_v21, %v564_v20  ;;  %vm571_vm8 = vweird.f32 %v1598_v21 }
 0xe80   :  { %vm572_vm10 = vmor %vm570_vm9, %vm571_vm8 }
 0xe81   :  { %v567_v23 = vsub.f32 1.0, %v566_v22 }
 0xe83   :  { %v568_v24 = vmul.f32 %v1598_v21, %v567_v23 }
 0xe85   :  { %v569_v25 = vadd.f32 %v1598_v21, %v568_v24 }
 0xe87   :  { %v573_v29 = vsel %vm572_vm10, %v1598_v21, %v569_v25 }
 0xe88   :  { %v578_v32 = vsel %vm575_vm11, %v577_v30, %v573_v29 }
 0xedf   :  { %v583_v31 = vpop.permute.xlu0 %582 }
 0xee0   :  { %v585_v33 = vmul.f32 %v583_v31, %v578_v32 }
 0xee2   :  { %587 = vrot.lane.b32.xlu1 %v585_v33, %s1820_s11 }
 0xf54   :  { %v588_v34 = vpop.permute.xlu1 %587 }
 0xf55   :  { %v590_v36 = vadd.f32 %v588_v34, %v1895_v43 }
 0xf57   :  { %1599 = vtanh.f32 %v590_v36 }
 0xf5d   :  { %v1600_v37 = vpop.eup %1599 }
 0xf5e   :  { %v592_v38 = vsub.f32 %v1965_v10, %v1600_v37 }
 0xf60   :  { %594 = vrot.lane.b32.xlu2 %v592_v38, %s1824_s3 }
 0xfba   :  { %v595_v41 = vpop.permute.xlu2 %594 }
 0xfbb   :  { %v597_v46 = vmul.f32 %v595_v41, %v578_v32 }
 0xfbd   :  { %599 = vrot.lane.b32.xlu0 %v597_v46, %s1823_s2 }
0x102f   :  { %v600_v47 = vpop.permute.xlu0 %599 }
0x1030   :  { %v1979_v48 = vadd.f32 %v1600_v37, %v600_v47 }
0x1032   :  { %v613_v39 = vpack.c.bf16 %v1979_v48, %v1979_v48 }
0x1034   :  { %615 = vrot.lane.b32.xlu1 %v613_v39, %s1820_s11 }
0x10a6   :  { %v616_v49 = vpop.permute.xlu1 %615 }
0x10a7   :  { %1489 = vmatmul.msk.bf16.vlgmr.msra.gmra.mxu0 %vm170_vm1, %v616_v49  ;;  %v2020_v49 = vld [vmem:[#allocation9 + $0x5] ss:$0 sm:$0xff] }
0x1124   :  { %v629_v43 = vpop.f32.mrf.mxu0 }
0x1125   :  { %v653_v50 = vadd.f32 %v629_v43, %v1878_v13  ;;  %v633_v52 = vadd.f32 %v629_v43, %v1898_v44  ;;  %v1540_v43 = vld [vmem:[#allocation8 + $0x28] sm:$0xff] }
0x1126   :  { %784 = vmatpush.bf16.msra.mxu2 %v1540_v43 }
0x1127   :  { %655 = vrot.lane.b32.xlu2 %v653_v50, %s1820_s11  ;;  %v1490_v53 = vmul.f32 -1.442695, %v633_v52  ;;  %v1541_v50 = vld [vmem:[#allocation8 + $0x30] sm:$0xff] }
0x1129   :  { %1601 = vpow2.f32 %v1490_v53 }
0x112c   :  { %v631_v51 = vpop.f32.mrf.mxu0 }
0x112f   :  { %v1602_v54 = vpop.eup %1601 }
0x1130   :  { %v637_v55 = vadd.f32 1.0, %v1602_v54  ;;  %v1539_v54 = vld [vmem:[#allocation8 + $0x20] sm:$0xff] }
0x1131   :  { %785 = vmatpush.bf16.msra.mxu2 %v1539_v54 }
0x1132   :  { %1603 = vrcp.f32 %v637_v55  ;;  %v649_v61 = vand.u32 2147483648, %v637_v55  ;;  %vm643_vm13 = vweird.f32 %v637_v55  ;;  %v647_v62 = vand.u32 2147483647, %v637_v55 }
0x1134   :  { %v650_v0 = vor.u32 1.1754944e-38, %v649_v61  ;;  %vm648_vm15 = vcmp.eq.f32.partialorder %v647_v62, 8.507059e+37 }
0x1138   :  { %v1604_v56 = vpop.eup %1603 }
0x1139   :  { %v639_v57 = vmul.f32 %v1604_v56, %v637_v55  ;;  %vm644_vm12 = vweird.f32 %v1604_v56 }
0x113a   :  { %vm645_vm14 = vmor %vm643_vm13, %vm644_vm12 }
0x113b   :  { %v640_v58 = vsub.f32 1.0, %v639_v57 }
0x113d   :  { %v641_v59 = vmul.f32 %v1604_v56, %v640_v58 }
0x113f   :  { %v642_v60 = vadd.f32 %v1604_v56, %v641_v59 }
0x1141   :  { %v646_v63 = vsel %vm645_vm14, %v1604_v56, %v642_v60 }
0x1142   :  { %v651_v2 = vsel %vm648_vm15, %v650_v0, %v646_v63  ;;  %v2035_v63 = vld [vmem:[#allocation9 + $0x2] ss:$0 sm:$0xff] }
0x1181   :  { %v656_v1 = vpop.permute.xlu2 %655 }
0x1182   :  { %v658_v3 = vmul.f32 %v656_v1, %v651_v2 }
0x1184   :  { %660 = vrot.lane.b32.xlu0 %v658_v3, %s1820_s11 }
0x11f6   :  { %v661_v4 = vpop.permute.xlu0 %660 }
0x11f7   :  { %v663_v5 = vadd.f32 %v661_v4, %v1898_v44 }
0x11f9   :  { %1605 = vtanh.f32 %v663_v5 }
0x11ff   :  { %v1606_v6 = vpop.eup %1605 }
0x1200   :  { %v665_v7 = vsub.f32 %v1979_v48, %v1606_v6 }
0x1202   :  { %667 = vrot.lane.b32.xlu1 %v665_v7, %s1824_s3 }
0x1274   :  { %v668_v9 = vpop.permute.xlu1 %667 }
0x1275   :  { %v670_v12 = vmul.f32 %v668_v9, %v651_v2 }
0x1277   :  { %672 = vrot.lane.b32.xlu2 %v670_v12, %s1823_s2 }
0x12d1   :  { %v673_v35 = vpop.permute.xlu2 %672 }
0x12d2   :  { %v675_v14 = vadd.f32 %v1606_v6, %v673_v35 }
0x12d4   :  { %v686_v40 = vpack.c.bf16 %v675_v14, %v675_v14 }
0x12d6   :  { %688 = vrot.lane.b32.xlu0 %v686_v40, %s1820_s11 }
0x1348   :  { %v689_v15 = vpop.permute.xlu0 %688 }
0x1349   :  { %1491 = vmatmul.msk.bf16.vlgmr.msra.gmra.mxu1 %vm170_vm1, %v689_v15 }
0x13c6   :  { %v702_v16 = vpop.f32.mrf.mxu1 }
0x13c7   :  { %v726_v44 = vadd.f32 %v702_v16, %v1878_v13  ;;  %v706_v18 = vadd.f32 %v702_v16, %v1901_v45 }
0x13c9   :  { %728 = vrot.lane.b32.xlu1 %v726_v44, %s1820_s11  ;;  %v1492_v19 = vmul.f32 -1.442695, %v706_v18 }
0x13cb   :  { %1607 = vpow2.f32 %v1492_v19 }
0x13ce   :  { %v704_v17 = vpop.f32.mrf.mxu1 }
0x13d1   :  { %v1608_v20 = vpop.eup %1607 }
0x13d2   :  { %v710_v21 = vadd.f32 1.0, %v1608_v20 }
0x13d4   :  { %1609 = vrcp.f32 %v710_v21  ;;  %v722_v28 = vand.u32 2147483648, %v710_v21  ;;  %vm716_vm2 = vweird.f32 %v710_v21  ;;  %v720_v29 = vand.u32 2147483647, %v710_v21 }
0x13d6   :  { %v723_v30 = vor.u32 1.1754944e-38, %v722_v28  ;;  %vm721_vm4 = vcmp.eq.f32.partialorder %v720_v29, 8.507059e+37 }
0x13da   :  { %v1610_v22 = vpop.eup %1609 }
0x13db   :  { %v712_v23 = vmul.f32 %v1610_v22, %v710_v21  ;;  %vm717_vm0 = vweird.f32 %v1610_v22 }
0x13dc   :  { %vm718_vm3 = vmor %vm716_vm2, %vm717_vm0 }
0x13dd   :  { %v713_v24 = vsub.f32 1.0, %v712_v23 }
0x13df   :  { %v714_v25 = vmul.f32 %v1610_v22, %v713_v24 }
0x13e1   :  { %v715_v26 = vadd.f32 %v1610_v22, %v714_v25 }
0x13e3   :  { %v719_v13 = vsel %vm718_vm3, %v1610_v22, %v715_v26 }
0x13e4   :  { %v724_v32 = vsel %vm721_vm4, %v723_v30, %v719_v13 }
0x143b   :  { %v729_v31 = vpop.permute.xlu1 %728 }
0x143c   :  { %v731_v33 = vmul.f32 %v729_v31, %v724_v32 }
0x143e   :  { %733 = vrot.lane.b32.xlu2 %v731_v33, %s1820_s11 }
0x1446   :  { %239 = vrot.lane.b32.xlu2 %v1909_v8, %s1820_s11 }
0x144e   :  { %458 = vrot.lane.b32.xlu2 %v1951_v27, %s1820_s11 }
0x1456   :  { %677 = vrot.lane.b32.xlu2 %v675_v14, %s1820_s11 }
0x1498   :  { %v734_v34 = vpop.permute.xlu2 %733 }
0x1499   :  { %v736_v36 = vadd.f32 %v734_v34, %v1901_v45 }
0x149b   :  { %1611 = vtanh.f32 %v736_v36 }
0x14a0   :  { %v240_v37 = vpop.permute.xlu2 %239 }
0x14a1   :  { %v1612_v38 = vpop.eup %1611  ;;  %243 = vst.msk [vmem:[#allocation2] sm:$0x3] %vm242_vm5, %v240_v37 }
0x14a2   :  { %v738_v41 = vsub.f32 %v675_v14, %v1612_v38 }
0x14a4   :  { %740 = vrot.lane.b32.xlu0 %v738_v41, %s1824_s3 }
0x14a8   :  { %v459_v46 = vpop.permute.xlu2 %458 }
0x14a9   :  { %461 = vst.msk [vmem:[#allocation2 + $0x6] sm:$0x3] %vm242_vm5, %v459_v46 }
0x14ac   :  { %312 = vrot.lane.b32.xlu0 %v1923_v42, %s1820_s11  ;;  %v1542_v42 = vld [vmem:[#allocation8 + $0x38] sm:$0xff] }
0x14ad   :  { %822 = vmatpush.bf16.msra.mxu3 %v1542_v42  ;;  %893 = vmatpush.bf16.msrb.mxu0 %v1542_v42 }
0x14ae   :  { %965 = vmatpush.bf16.msrb.mxu1 %v1542_v42  ;;  %1037 = vmatpush.bf16.msrb.mxu2 %v1542_v42 }
0x14b0   :  { %v678_v8 = vpop.permute.xlu2 %677 }
0x14b1   :  { %680 = vst.msk [vmem:[#allocation2 + $0xc] sm:$0x3] %vm242_vm5, %v678_v8  ;;  %823 = vmatpush.bf16.msra.mxu3 %v1541_v50  ;;  %894 = vmatpush.bf16.msrb.mxu0 %v1541_v50 }
0x14b2   :  { %966 = vmatpush.bf16.msrb.mxu1 %v1541_v50  ;;  %1038 = vmatpush.bf16.msrb.mxu2 %v1541_v50 }
0x14b4   :  { %531 = vrot.lane.b32.xlu0 %v1965_v10, %s1820_s11  ;;  %v1562_v10 = vld [vmem:[#allocation9 + $0x3] ss:$0 sm:$0xff] }
0x14b5   :  { %1109 = vmatpush.bf16.msrb.mxu3 %v1542_v42  ;;  %1176 = vmatpush.bf16.msra.mxu0 %v1542_v42 }
0x14b6   :  { %1248 = vmatpush.bf16.msra.mxu1 %v1542_v42 }
0x14b9   :  { %1110 = vmatpush.bf16.msrb.mxu3 %v1541_v50  ;;  %1177 = vmatpush.bf16.msra.mxu0 %v1541_v50 }
0x14ba   :  { %1249 = vmatpush.bf16.msra.mxu1 %v1541_v50 }
0x1516   :  { %v741_v45 = vpop.permute.xlu0 %740 }
0x1517   :  { %v743_v27 = vmul.f32 %v741_v45, %v724_v32 }
0x1519   :  { %745 = vrot.lane.b32.xlu1 %v743_v27, %s1823_s2 }
0x151e   :  { %v313_v47 = vpop.permute.xlu0 %312 }
0x151f   :  { %315 = vst.msk [vmem:[#allocation2 + $0x2] sm:$0x3] %vm242_vm5, %v313_v47 }
0x1521   :  { %385 = vrot.lane.b32.xlu1 %v1937_v11, %s1820_s11  ;;  %v800_v11 = vpack.c.bf16 %v2020_v49, %v2020_v49 }
0x1523   :  { %1510 = vmatmul.msk.bf16.vlgmr.msra.gmra.mxu3 %vm170_vm1, %v800_v11 }
0x1526   :  { %v532_v39 = vpop.permute.xlu0 %531 }
0x1527   :  { %534 = vst.msk [vmem:[#allocation2 + $0x8] sm:$0x3] %vm242_vm5, %v532_v39 }
0x1529   :  { %604 = vrot.lane.b32.xlu1 %v1979_v48, %s1820_s11 }
0x1531   :  { %850 = vrot.lane.b32.xlu1 %v1562_v10, %s1820_s11 }
0x158b   :  { %v746_v48 = vpop.permute.xlu1 %745 }
0x158c   :  { %v748_v51 = vadd.f32 %v1612_v38, %v746_v48 }
0x158e   :  { %750 = vrot.lane.b32.xlu0 %v748_v51, %s1820_s11 }
0x1593   :  { %v386_v52 = vpop.permute.xlu1 %385 }
0x1594   :  { %388 = vst.msk [vmem:[#allocation2 + $0x4] sm:$0x3] %vm242_vm5, %v386_v52 }
0x159b   :  { %v605_v53 = vpop.permute.xlu1 %604  ;;  %v754_v57 = vld [vmem:[#allocation2] sm:$0xff] }
0x159c   :  { %607 = vst.msk [vmem:[#allocation2 + $0xa] sm:$0x3] %vm242_vm5, %v605_v53 }
0x15a3   :  { %v2030_v56 = vpop.permute.xlu1 %850 }
0x15a6   :  { %v825_v59 = vpop.f32.mrf.mxu3 }
0x15a7   :  { %v853_v61 = vadd.f32 %v2030_v56, %v825_v59 }
0x15a9   :  { %855 = vrot.lane.b32.xlu2 %v853_v61, %s1820_s11 }
0x15ae   :  { %v827_v62 = vpop.f32.mrf.mxu3 }
0x1600   :  { %v751_v55 = vpop.permute.xlu0 %750 }
0x1601   :  { %753 = vst.msk [vmem:[#allocation2 + $0xe] sm:$0x3] %vm242_vm5, %v751_v55 }
0x1603   :  { %v856_v15 = vpop.permute.xlu2 %855 }
0x1608   :  { %v755_v58 = vld [vmem:[#allocation2 + $0x8] sm:$0xff] }
0x1609   :  { %v756_v60 = vpack.c.bf16 %v755_v58, %v754_v57 }
0x160b   :  { %1501 = vmatmul.msk.bf16.vlgmr.msra.gmra.mxu2 %vm170_vm1, %v756_v60 }
0x160c   :  { %1320 = vmatpush.bf16.msra.mxu2 %v1542_v42 }
0x1610   :  { %1321 = vmatpush.bf16.msra.mxu2 %v1541_v50 }
0x168e   :  { %v787_v0 = vpop.f32.mrf.mxu2 }
0x168f   :  { %v2038_v1 = vadd.f32 %v2035_v63, %v787_v0 }
0x1691   :  { %v829_v2 = vadd.f32 %v825_v59, %v2038_v1 }
0x1693   :  { %v1511_v3 = vmul.f32 -1.442695, %v829_v2 }
0x1695   :  { %1613 = vpow2.f32 %v1511_v3 }
0x169b   :  { %v1614_v4 = vpop.eup %1613 }
0x169c   :  { %v833_v5 = vadd.f32 1.0, %v1614_v4 }
0x169e   :  { %1615 = vrcp.f32 %v833_v5  ;;  %v845_v12 = vand.u32 2147483648, %v833_v5  ;;  %v843_v14 = vand.u32 2147483647, %v833_v5  ;;  %vm839_vm7 = vweird.f32 %v833_v5 }
0x16a0   :  { %v846_v16 = vor.u32 1.1754944e-38, %v845_v12  ;;  %vm844_vm9 = vcmp.eq.f32.partialorder %v843_v14, 8.507059e+37 }
0x16a4   :  { %v1616_v6 = vpop.eup %1615 }
0x16a5   :  { %v835_v7 = vmul.f32 %v1616_v6, %v833_v5  ;;  %vm840_vm6 = vweird.f32 %v1616_v6 }
0x16a6   :  { %vm841_vm8 = vmor %vm839_vm7, %vm840_vm6 }
0x16a7   :  { %v836_v9 = vsub.f32 1.0, %v835_v7 }
0x16a9   :  { %v837_v35 = vmul.f32 %v1616_v6, %v836_v9 }
0x16ab   :  { %v838_v40 = vadd.f32 %v1616_v6, %v837_v35 }
0x16ad   :  { %v842_v44 = vsel %vm841_vm8, %v1616_v6, %v838_v40 }
0x16ae   :  { %v847_v17 = vsel %vm844_vm9, %v846_v16, %v842_v44 }
0x16af   :  { %v858_v18 = vmul.f32 %v856_v15, %v847_v17 }
0x16b1   :  { %860 = vrot.lane.b32.xlu0 %v858_v18, %s1820_s11 }
0x1723   :  { %v861_v19 = vpop.permute.xlu0 %860 }
0x1724   :  { %v863_v20 = vadd.f32 %v861_v19, %v2038_v1 }
0x1726   :  { %1617 = vtanh.f32 %v863_v20 }
0x172c   :  { %v1618_v21 = vpop.eup %1617 }
0x172d   :  { %866 = vrot.lane.b32.xlu1 %v1618_v21, %s1820_s11 }
0x179f   :  { %v867_v22 = vpop.permute.xlu1 %866 }
0x17a0   :  { %v869_v23 = vsub.f32 %v2020_v49, %v867_v22 }
0x17a2   :  { %871 = vrot.lane.b32.xlu2 %v869_v23, %s1823_s2 }
0x17fc   :  { %v872_v24 = vpop.permute.xlu2 %871 }
0x17fd   :  { %v874_v25 = vmul.f32 %v872_v24, %v847_v17 }
0x17ff   :  { %876 = vrot.lane.b32.xlu0 %v874_v25, %s1823_s2 }
0x1871   :  { %v877_v26 = vpop.permute.xlu0 %876 }
0x1872   :  { %v879_v28 = vadd.f32 %v1618_v21, %v877_v26 }
0x1874   :  { %v880_v29 = vpack.c.bf16 %v879_v28, %v879_v28 }
0x1876   :  { %882 = vrot.lane.b32.xlu1 %v880_v29, %s1820_s11 }
0x18e8   :  { %v883_v13 = vpop.permute.xlu1 %882 }
0x18e9   :  { %1512 = vmatmul.msk.bf16.vlgmr.msrb.gmra.mxu0 %vm170_vm1, %v883_v13 }
0x1966   :  { %v896_v30 = vpop.f32.mrf.mxu0 }
0x1967   :  { %v923_v31 = vadd.f32 %v896_v30, %v2030_v56  ;;  %v901_v34 = vrot.slane %v896_v30, 6 }
0x1969   :  { %v925_v32 = vrot.slane %v923_v31, 6  ;;  %v903_v36 = vadd.f32 %v901_v34, %v2038_v1 }
0x196b   :  { %926 = vrot.lane.b32.xlu2 %v925_v32, %s1820_s11  ;;  %v1513_v37 = vmul.f32 -1.442695, %v903_v36 }
0x196d   :  { %1619 = vpow2.f32 %v1513_v37 }
0x196e   :  { %v898_v33 = vpop.f32.mrf.mxu0 }
0x1973   :  { %v1620_v38 = vpop.eup %1619 }
0x1974   :  { %v907_v41 = vadd.f32 1.0, %v1620_v38  ;;  %v789_v38 = vpop.f32.mrf.mxu2 }
0x1976   :  { %1621 = vrcp.f32 %v907_v41  ;;  %v919_v39 = vand.u32 2147483648, %v907_v41  ;;  %vm913_vm11 = vweird.f32 %v907_v41  ;;  %v917_v42 = vand.u32 2147483647, %v907_v41 }
0x1978   :  { %v920_v10 = vor.u32 1.1754944e-38, %v919_v39  ;;  %vm918_vm13 = vcmp.eq.f32.partialorder %v917_v42, 8.507059e+37 }
0x197c   :  { %v1622_v46 = vpop.eup %1621 }
0x197d   :  { %v909_v8 = vmul.f32 %v1622_v46, %v907_v41  ;;  %vm914_vm10 = vweird.f32 %v1622_v46 }
0x197e   :  { %vm915_vm12 = vmor %vm913_vm11, %vm914_vm10 }
0x197f   :  { %v910_v45 = vsub.f32 1.0, %v909_v8 }
0x1981   :  { %v911_v27 = vmul.f32 %v1622_v46, %v910_v45 }
0x1983   :  { %v912_v47 = vadd.f32 %v1622_v46, %v911_v27 }
0x1985   :  { %v916_v49 = vsel %vm915_vm12, %v1622_v46, %v912_v47 }
0x1986   :  { %v921_v50 = vsel %vm918_vm13, %v920_v10, %v916_v49 }
0x19c5   :  { %v927_v43 = vpop.permute.xlu2 %926 }
0x19c6   :  { %v929_v11 = vmul.f32 %v927_v43, %v921_v50 }
0x19c8   :  { %931 = vrot.lane.b32.xlu0 %v929_v11, %s1820_s11 }
0x1a3a   :  { %v932_v48 = vpop.permute.xlu0 %931 }
0x1a3b   :  { %v934_v51 = vadd.f32 %v932_v48, %v2038_v1 }
0x1a3d   :  { %1623 = vtanh.f32 %v934_v51 }
0x1a43   :  { %v1624_v52 = vpop.eup %1623 }
0x1a44   :  { %v937_v53 = vrot.slane %v1624_v52, 2 }
0x1a46   :  { %v939_v54 = vsub.f32 %v879_v28, %v937_v53 }
0x1a48   :  { %v941_v55 = vrot.slane %v939_v54, 6 }
0x1a4a   :  { %942 = vrot.lane.b32.xlu1 %v941_v55, %s1824_s3 }
0x1abc   :  { %v943_v57 = vpop.permute.xlu1 %942 }
0x1abd   :  { %v945_v58 = vmul.f32 %v943_v57, %v921_v50 }
0x1abf   :  { %947 = vrot.lane.b32.xlu2 %v945_v58, %s1823_s2 }
0x1b19   :  { %v948_v59 = vpop.permute.xlu2 %947 }
0x1b1a   :  { %v950_v60 = vadd.f32 %v1624_v52, %v948_v59 }
0x1b1c   :  { %v951_v61 = vpack.c.bf16 %v950_v60, %v950_v60 }
0x1b1e   :  { %v953_v62 = vrot.slane %v951_v61, 1 }
0x1b20   :  { %954 = vrot.lane.b32.xlu0 %v953_v62, %s1820_s11 }
0x1b92   :  { %v955_v0 = vpop.permute.xlu0 %954 }
0x1b93   :  { %1514 = vmatmul.msk.bf16.vlgmr.msrb.gmra.mxu1 %vm170_vm1, %v955_v0 }
0x1c10   :  { %v968_v2 = vpop.f32.mrf.mxu1 }
0x1c11   :  { %v995_v3 = vadd.f32 %v968_v2, %v2030_v56  ;;  %v973_v6 = vrot.slane %v968_v2, 4 }
0x1c13   :  { %v997_v4 = vrot.slane %v995_v3, 4  ;;  %v975_v7 = vadd.f32 %v973_v6, %v2038_v1 }
0x1c15   :  { %998 = vrot.lane.b32.xlu1 %v997_v4, %s1820_s11  ;;  %v1515_v9 = vmul.f32 -1.442695, %v975_v7 }
0x1c17   :  { %1625 = vpow2.f32 %v1515_v9 }
0x1c18   :  { %v970_v5 = vpop.f32.mrf.mxu1 }
0x1c1d   :  { %v1626_v12 = vpop.eup %1625 }
0x1c1e   :  { %v979_v35 = vadd.f32 1.0, %v1626_v12 }
0x1c20   :  { %1627 = vrcp.f32 %v979_v35  ;;  %v991_v17 = vand.u32 2147483648, %v979_v35  ;;  %vm985_vm15 = vweird.f32 %v979_v35  ;;  %v989_v18 = vand.u32 2147483647, %v979_v35 }
0x1c22   :  { %v992_v20 = vor.u32 1.1754944e-38, %v991_v17  ;;  %vm990_vm2 = vcmp.eq.f32.partialorder %v989_v18, 8.507059e+37 }
0x1c26   :  { %v1628_v14 = vpop.eup %1627 }
0x1c27   :  { %v981_v40 = vmul.f32 %v1628_v14, %v979_v35  ;;  %vm986_vm14 = vweird.f32 %v1628_v14 }
0x1c28   :  { %vm987_vm0 = vmor %vm985_vm15, %vm986_vm14 }
0x1c29   :  { %v982_v15 = vsub.f32 1.0, %v981_v40  ;;  %v2079_v40 = vadd.f32 %v2035_v63, %v789_v38 }
0x1c2b   :  { %v983_v16 = vmul.f32 %v1628_v14, %v982_v15 }
0x1c2d   :  { %v984_v44 = vadd.f32 %v1628_v14, %v983_v16 }
0x1c2f   :  { %v988_v19 = vsel %vm987_vm0, %v1628_v14, %v984_v44 }
0x1c30   :  { %v993_v22 = vsel %vm990_vm2, %v992_v20, %v988_v19 }
0x1c87   :  { %v999_v21 = vpop.permute.xlu1 %998 }
0x1c88   :  { %v1001_v23 = vmul.f32 %v999_v21, %v993_v22 }
0x1c8a   :  { %1003 = vrot.lane.b32.xlu2 %v1001_v23, %s1820_s11 }
0x1ce4   :  { %v1004_v24 = vpop.permute.xlu2 %1003 }
0x1ce5   :  { %v1006_v25 = vadd.f32 %v1004_v24, %v2038_v1 }
0x1ce7   :  { %1629 = vtanh.f32 %v1006_v25 }
0x1ced   :  { %v1630_v26 = vpop.eup %1629 }
0x1cee   :  { %v1009_v28 = vrot.slane %v1630_v26, 2 }
0x1cf0   :  { %v1011_v29 = vsub.f32 %v950_v60, %v1009_v28 }
0x1cf2   :  { %v1013_v13 = vrot.slane %v1011_v29, 6 }
0x1cf4   :  { %1014 = vrot.lane.b32.xlu0 %v1013_v13, %s1824_s3 }
0x1d66   :  { %v1015_v30 = vpop.permute.xlu0 %1014 }
0x1d67   :  { %v1017_v31 = vmul.f32 %v1015_v30, %v993_v22 }
0x1d69   :  { %1019 = vrot.lane.b32.xlu1 %v1017_v31, %s1823_s2 }
0x1ddb   :  { %v1020_v32 = vpop.permute.xlu1 %1019 }
0x1ddc   :  { %v1022_v33 = vadd.f32 %v1630_v26, %v1020_v32 }
0x1dde   :  { %v1023_v34 = vpack.c.bf16 %v1022_v33, %v1022_v33 }
0x1de0   :  { %v1025_v36 = vrot.slane %v1023_v34, 2 }
0x1de2   :  { %1026 = vrot.lane.b32.xlu2 %v1025_v36, %s1820_s11 }
0x1e3c   :  { %v1027_v37 = vpop.permute.xlu2 %1026 }
0x1e3d   :  { %1516 = vmatmul.msk.bf16.vlgmr.msrb.gmra.mxu2 %vm170_vm1, %v1027_v37 }
0x1ec0   :  { %v1040_v41 = vpop.f32.mrf.mxu2 }
0x1ec1   :  { %v1067_v46 = vadd.f32 %v1040_v41, %v2030_v56  ;;  %v1045_v27 = vrot.slane %v1040_v41, 2 }
0x1ec3   :  { %v1069_v8 = vrot.slane %v1067_v46, 2  ;;  %v1047_v47 = vadd.f32 %v1045_v27, %v2038_v1 }
0x1ec5   :  { %1070 = vrot.lane.b32.xlu0 %v1069_v8, %s1820_s11  ;;  %v1517_v39 = vmul.f32 -1.442695, %v1047_v47 }
0x1ec7   :  { %1631 = vpow2.f32 %v1517_v39 }
0x1ec8   :  { %v1042_v45 = vpop.f32.mrf.mxu2 }
0x1ecd   :  { %v1632_v42 = vpop.eup %1631 }
0x1ece   :  { %v1051_v49 = vadd.f32 1.0, %v1632_v42 }
0x1ed0   :  { %1633 = vrcp.f32 %v1051_v49  ;;  %v1063_v51 = vand.u32 2147483648, %v1051_v49  ;;  %vm1057_vm4 = vweird.f32 %v1051_v49  ;;  %v1061_v52 = vand.u32 2147483647, %v1051_v49 }
0x1ed2   :  { %v1064_v54 = vor.u32 1.1754944e-38, %v1063_v51  ;;  %vm1062_vm6 = vcmp.eq.f32.partialorder %v1061_v52, 8.507059e+37 }
0x1ed6   :  { %v1634_v10 = vpop.eup %1633 }
0x1ed7   :  { %v1053_v43 = vmul.f32 %v1634_v10, %v1051_v49  ;;  %vm1058_vm3 = vweird.f32 %v1634_v10 }
0x1ed8   :  { %vm1059_vm5 = vmor %vm1057_vm4, %vm1058_vm3 }
0x1ed9   :  { %v1054_v50 = vsub.f32 1.0, %v1053_v43 }
0x1edb   :  { %v1055_v11 = vmul.f32 %v1634_v10, %v1054_v50 }
0x1edd   :  { %v1056_v48 = vadd.f32 %v1634_v10, %v1055_v11 }
0x1edf   :  { %v1060_v53 = vsel %vm1059_vm5, %v1634_v10, %v1056_v48 }
0x1ee0   :  { %v1065_v57 = vsel %vm1062_vm6, %v1064_v54, %v1060_v53 }
0x1f37   :  { %v1071_v55 = vpop.permute.xlu0 %1070 }
0x1f38   :  { %v1073_v58 = vmul.f32 %v1071_v55, %v1065_v57 }
0x1f3a   :  { %1075 = vrot.lane.b32.xlu1 %v1073_v58, %s1820_s11 }
0x1fac   :  { %v1076_v59 = vpop.permute.xlu1 %1075 }
0x1fad   :  { %v1078_v60 = vadd.f32 %v1076_v59, %v2038_v1 }
0x1faf   :  { %1635 = vtanh.f32 %v1078_v60 }
0x1fb5   :  { %v1636_v61 = vpop.eup %1635 }
0x1fb6   :  { %v1081_v62 = vrot.slane %v1636_v61, 2 }
0x1fb8   :  { %v1083_v0 = vsub.f32 %v1022_v33, %v1081_v62 }
0x1fba   :  { %v1085_v2 = vrot.slane %v1083_v0, 6 }
0x1fbc   :  { %1086 = vrot.lane.b32.xlu2 %v1085_v2, %s1824_s3 }
0x2016   :  { %v1087_v3 = vpop.permute.xlu2 %1086 }
0x2017   :  { %v1089_v4 = vmul.f32 %v1087_v3, %v1065_v57 }
0x2019   :  { %1091 = vrot.lane.b32.xlu0 %v1089_v4, %s1823_s2 }
0x208b   :  { %v1092_v5 = vpop.permute.xlu0 %1091 }
0x208c   :  { %v1094_v6 = vadd.f32 %v1636_v61, %v1092_v5 }
0x208e   :  { %v1095_v7 = vpack.c.bf16 %v1094_v6, %v1094_v6 }
0x2090   :  { %v1097_v9 = vrot.slane %v1095_v7, 3 }
0x2092   :  { %1098 = vrot.lane.b32.xlu1 %v1097_v9, %s1820_s11 }
0x2104   :  { %v1099_v12 = vpop.permute.xlu1 %1098 }
0x2105   :  { %1518 = vmatmul.msk.bf16.vlgmr.msrb.gmra.mxu3 %vm170_vm1, %v1099_v12 }
0x2188   :  { %v1112_v1 = vpop.f32.mrf.mxu3 }
0x2189   :  { %v1136_v35 = vadd.f32 %v1112_v1, %v2030_v56  ;;  %v1116_v15 = vadd.f32 %v1112_v1, %v2079_v40 }
0x218b   :  { %1138 = vrot.lane.b32.xlu2 %v1136_v35, %s1820_s11  ;;  %v1519_v16 = vmul.f32 -1.442695, %v1116_v15 }
0x218d   :  { %1637 = vpow2.f32 %v1519_v16 }
0x2190   :  { %v1114_v14 = vpop.f32.mrf.mxu3 }
0x2193   :  { %v1638_v44 = vpop.eup %1637 }
0x2194   :  { %v1120_v17 = vadd.f32 1.0, %v1638_v44 }
0x2196   :  { %1639 = vrcp.f32 %v1120_v17  ;;  %v1132_v23 = vand.u32 2147483648, %v1120_v17  ;;  %vm1126_vm8 = vweird.f32 %v1120_v17  ;;  %v1130_v24 = vand.u32 2147483647, %v1120_v17 }
0x2198   :  { %v1133_v63 = vor.u32 1.1754944e-38, %v1132_v23  ;;  %vm1131_vm10 = vcmp.eq.f32.partialorder %v1130_v24, 8.507059e+37 }
0x219c   :  { %v1640_v18 = vpop.eup %1639 }
0x219d   :  { %v1122_v19 = vmul.f32 %v1640_v18, %v1120_v17  ;;  %vm1127_vm7 = vweird.f32 %v1640_v18 }
0x219e   :  { %vm1128_vm9 = vmor %vm1126_vm8, %vm1127_vm7  ;;  %vm1417_vm8 = vcmask 123904  }
0x219f   :  { %v1123_v20 = vsub.f32 1.0, %v1122_v19 }
0x21a1   :  { %v1124_v21 = vmul.f32 %v1640_v18, %v1123_v20 }
0x21a3   :  { %v1125_v22 = vadd.f32 %v1640_v18, %v1124_v21 }
0x21a5   :  { %v1129_v25 = vsel %vm1128_vm9, %v1640_v18, %v1125_v22 }
0x21a6   :  { %v1134_v28 = vsel %vm1131_vm10, %v1133_v63, %v1129_v25 }
0x21e5   :  { %v1139_v26 = vpop.permute.xlu2 %1138 }
0x21e6   :  { %v1141_v29 = vmul.f32 %v1139_v26, %v1134_v28 }
0x21e8   :  { %1143 = vrot.lane.b32.xlu0 %v1141_v29, %s1820_s11 }
0x225a   :  { %v1144_v13 = vpop.permute.xlu0 %1143 }
0x225b   :  { %v1146_v30 = vadd.f32 %v1144_v13, %v2079_v40 }
0x225d   :  { %1641 = vtanh.f32 %v1146_v30 }
0x2263   :  { %v1642_v31 = vpop.eup %1641 }
0x2264   :  { %v1149_v32 = vrot.slane %v1642_v31, 2 }
0x2266   :  { %v1151_v33 = vsub.f32 %v1094_v6, %v1149_v32 }
0x2268   :  { %v1153_v34 = vrot.slane %v1151_v33, 6 }
0x226a   :  { %1154 = vrot.lane.b32.xlu1 %v1153_v34, %s1824_s3 }
0x22dc   :  { %v1155_v36 = vpop.permute.xlu1 %1154 }
0x22dd   :  { %v1157_v37 = vmul.f32 %v1155_v36, %v1134_v28 }
0x22df   :  { %1159 = vrot.lane.b32.xlu2 %v1157_v37, %s1823_s2 }
0x2339   :  { %v1160_v38 = vpop.permute.xlu2 %1159 }
0x233a   :  { %v1162_v41 = vadd.f32 %v1642_v31, %v1160_v38 }
0x233c   :  { %v1163_v46 = vpack.c.bf16 %v1162_v41, %v1162_v41 }
0x233e   :  { %1165 = vrot.lane.b32.xlu0 %v1163_v46, %s1820_s11 }
0x23b0   :  { %v1166_v8 = vpop.permute.xlu0 %1165 }
0x23b1   :  { %1520 = vmatmul.msk.bf16.vlgmr.msra.gmra.mxu0 %vm170_vm1, %v1166_v8 }
0x242e   :  { %v1179_v45 = vpop.f32.mrf.mxu0 }
0x242f   :  { %v1206_v27 = vadd.f32 %v1179_v45, %v2030_v56  ;;  %v1184_v42 = vrot.slane %v1179_v45, 6 }
0x2431   :  { %v1208_v47 = vrot.slane %v1206_v27, 6  ;;  %v1186_v49 = vadd.f32 %v1184_v42, %v2079_v40 }
0x2433   :  { %1209 = vrot.lane.b32.xlu1 %v1208_v47, %s1820_s11  ;;  %v1521_v10 = vmul.f32 -1.442695, %v1186_v49 }
0x2435   :  { %1643 = vpow2.f32 %v1521_v10 }
0x2436   :  { %v1181_v39 = vpop.f32.mrf.mxu0 }
0x243b   :  { %v1644_v43 = vpop.eup %1643 }
0x243c   :  { %v1190_v50 = vadd.f32 1.0, %v1644_v43 }
0x243e   :  { %1645 = vrcp.f32 %v1190_v50  ;;  %v1202_v54 = vand.u32 2147483648, %v1190_v50  ;;  %vm1196_vm12 = vweird.f32 %v1190_v50  ;;  %v1200_v55 = vand.u32 2147483647, %v1190_v50 }
0x2440   :  { %v1203_v58 = vor.u32 1.1754944e-38, %v1202_v54  ;;  %vm1201_vm14 = vcmp.eq.f32.partialorder %v1200_v55, 8.507059e+37 }
0x2444   :  { %v1646_v11 = vpop.eup %1645 }
0x2445   :  { %v1192_v48 = vmul.f32 %v1646_v11, %v1190_v50  ;;  %vm1197_vm11 = vweird.f32 %v1646_v11 }
0x2446   :  { %vm1198_vm13 = vmor %vm1196_vm12, %vm1197_vm11 }
0x2447   :  { %v1193_v51 = vsub.f32 1.0, %v1192_v48 }
0x2449   :  { %v1194_v52 = vmul.f32 %v1646_v11, %v1193_v51 }
0x244b   :  { %v1195_v53 = vadd.f32 %v1646_v11, %v1194_v52 }
0x244d   :  { %v1199_v57 = vsel %vm1198_vm13, %v1646_v11, %v1195_v53 }
0x244e   :  { %v1204_v60 = vsel %vm1201_vm14, %v1203_v58, %v1199_v57 }
0x24a5   :  { %v1210_v59 = vpop.permute.xlu1 %1209 }
0x24a6   :  { %v1212_v61 = vmul.f32 %v1210_v59, %v1204_v60 }
0x24a8   :  { %1214 = vrot.lane.b32.xlu2 %v1212_v61, %s1820_s11 }
0x2502   :  { %v1215_v62 = vpop.permute.xlu2 %1214 }
0x2503   :  { %v1217_v0 = vadd.f32 %v1215_v62, %v2079_v40 }
0x2505   :  { %1647 = vtanh.f32 %v1217_v0 }
0x250b   :  { %v1648_v2 = vpop.eup %1647 }
0x250c   :  { %v1220_v3 = vrot.slane %v1648_v2, 2 }
0x250e   :  { %v1222_v4 = vsub.f32 %v1162_v41, %v1220_v3 }
0x2510   :  { %v1224_v5 = vrot.slane %v1222_v4, 6 }
0x2512   :  { %1225 = vrot.lane.b32.xlu0 %v1224_v5, %s1824_s3 }
0x2584   :  { %v1226_v6 = vpop.permute.xlu0 %1225 }
0x2585   :  { %v1228_v7 = vmul.f32 %v1226_v6, %v1204_v60 }
0x2587   :  { %1230 = vrot.lane.b32.xlu1 %v1228_v7, %s1823_s2 }
0x25f9   :  { %v1231_v9 = vpop.permute.xlu1 %1230 }
0x25fa   :  { %v1233_v12 = vadd.f32 %v1648_v2, %v1231_v9 }
0x25fc   :  { %v1234_v1 = vpack.c.bf16 %v1233_v12, %v1233_v12 }
0x25fe   :  { %v1236_v35 = vrot.slane %v1234_v1, 1 }
0x2600   :  { %1237 = vrot.lane.b32.xlu2 %v1236_v35, %s1820_s11 }
0x265a   :  { %v1238_v14 = vpop.permute.xlu2 %1237 }
0x265b   :  { %1522 = vmatmul.msk.bf16.vlgmr.msra.gmra.mxu1 %vm170_vm1, %v1238_v14 }
0x26d8   :  { %v1251_v15 = vpop.f32.mrf.mxu1 }
0x26d9   :  { %v1278_v16 = vadd.f32 %v1251_v15, %v2030_v56  ;;  %v1256_v18 = vrot.slane %v1251_v15, 4  ;;  %v1544_v15 = vld [vmem:[#allocation8 + $0x48] sm:$0xff] }
0x26da   :  { %1410 = vmatpush.bf16.msra.mxu3 %v1544_v15 }
0x26db   :  { %v1280_v44 = vrot.slane %v1278_v16, 4  ;;  %v1258_v19 = vadd.f32 %v1256_v18, %v2079_v40  ;;  %v1543_v16 = vld [vmem:[#allocation8 + $0x40] sm:$0xff] }
0x26dd   :  { %1281 = vrot.lane.b32.xlu0 %v1280_v44, %s1820_s11  ;;  %v1523_v20 = vmul.f32 -1.442695, %v1258_v19 }
0x26de   :  { %1411 = vmatpush.bf16.msra.mxu3 %v1543_v16 }
0x26df   :  { %1649 = vpow2.f32 %v1523_v20  ;;  %v1564_v20 = vld [vmem:[#allocation9 + $0x6] ss:$0 sm:$0xff] }
0x26e0   :  { %v1253_v17 = vpop.f32.mrf.mxu1 }
0x26e5   :  { %v1650_v21 = vpop.eup %1649 }
0x26e6   :  { %v1262_v22 = vadd.f32 1.0, %v1650_v21 }
0x26e8   :  { %1651 = vrcp.f32 %v1262_v22  ;;  %v1274_v28 = vand.u32 2147483648, %v1262_v22  ;;  %vm1268_vm0 = vweird.f32 %v1262_v22  ;;  %v1272_v29 = vand.u32 2147483647, %v1262_v22 }
0x26ea   :  { %v1275_v30 = vor.u32 1.1754944e-38, %v1274_v28  ;;  %vm1273_vm3 = vcmp.eq.f32.partialorder %v1272_v29, 8.507059e+37 }
0x26ee   :  { %v1652_v23 = vpop.eup %1651 }
0x26ef   :  { %v1264_v24 = vmul.f32 %v1652_v23, %v1262_v22  ;;  %vm1269_vm15 = vweird.f32 %v1652_v23 }
0x26f0   :  { %vm1270_vm2 = vmor %vm1268_vm0, %vm1269_vm15 }
0x26f1   :  { %v1265_v25 = vsub.f32 1.0, %v1264_v24 }
0x26f3   :  { %v1266_v63 = vmul.f32 %v1652_v23, %v1265_v25 }
0x26f5   :  { %v1267_v26 = vadd.f32 %v1652_v23, %v1266_v63 }
0x26f7   :  { %v1271_v13 = vsel %vm1270_vm2, %v1652_v23, %v1267_v26 }
0x26f8   :  { %v1276_v32 = vsel %vm1273_vm3, %v1275_v30, %v1271_v13 }
0x274f   :  { %v1282_v31 = vpop.permute.xlu0 %1281 }
0x2750   :  { %v1284_v33 = vmul.f32 %v1282_v31, %v1276_v32 }
0x2752   :  { %1286 = vrot.lane.b32.xlu1 %v1284_v33, %s1820_s11 }
0x27c4   :  { %v1287_v34 = vpop.permute.xlu1 %1286 }
0x27c5   :  { %v1289_v36 = vadd.f32 %v1287_v34, %v2079_v40 }
0x27c7   :  { %1653 = vtanh.f32 %v1289_v36 }
0x27cd   :  { %v1654_v37 = vpop.eup %1653 }
0x27ce   :  { %v1292_v38 = vrot.slane %v1654_v37, 2 }
0x27d0   :  { %v1294_v41 = vsub.f32 %v1233_v12, %v1292_v38 }
0x27d2   :  { %v1296_v46 = vrot.slane %v1294_v41, 6 }
0x27d4   :  { %1297 = vrot.lane.b32.xlu2 %v1296_v46, %s1824_s3 }
0x282e   :  { %v1298_v8 = vpop.permute.xlu2 %1297 }
0x282f   :  { %v1300_v45 = vmul.f32 %v1298_v8, %v1276_v32 }
0x2831   :  { %1302 = vrot.lane.b32.xlu0 %v1300_v45, %s1823_s2 }
0x28a3   :  { %v1303_v27 = vpop.permute.xlu0 %1302 }
0x28a4   :  { %v1305_v47 = vadd.f32 %v1654_v37, %v1303_v27 }
0x28a6   :  { %v1306_v39 = vpack.c.bf16 %v1305_v47, %v1305_v47 }
0x28a8   :  { %v1308_v42 = vrot.slane %v1306_v39, 2 }
0x28aa   :  { %1309 = vrot.lane.b32.xlu1 %v1308_v42, %s1820_s11 }
0x291c   :  { %v1310_v49 = vpop.permute.xlu1 %1309 }
0x291d   :  { %1524 = vmatmul.msk.bf16.vlgmr.msra.gmra.mxu2 %vm170_vm1, %v1310_v49 }
0x29a0   :  { %v1323_v10 = vpop.f32.mrf.mxu2 }
0x29a1   :  { %v1350_v43 = vadd.f32 %v1323_v10, %v2030_v56  ;;  %v1328_v48 = vrot.slane %v1323_v10, 2 }
0x29a3   :  { %v1352_v50 = vrot.slane %v1350_v43, 2  ;;  %v1330_v51 = vadd.f32 %v1328_v48, %v2079_v40 }
0x29a5   :  { %1353 = vrot.lane.b32.xlu2 %v1352_v50, %s1820_s11  ;;  %v1525_v52 = vmul.f32 -1.442695, %v1330_v51 }
0x29a7   :  { %1655 = vpow2.f32 %v1525_v52 }
0x29a8   :  { %v1325_v11 = vpop.f32.mrf.mxu2 }
0x29ad   :  { %v1656_v53 = vpop.eup %1655 }
0x29ae   :  { %v1334_v54 = vadd.f32 1.0, %v1656_v53 }
0x29b0   :  { %1657 = vrcp.f32 %v1334_v54  ;;  %v1346_v61 = vand.u32 2147483648, %v1334_v54  ;;  %vm1340_vm5 = vweird.f32 %v1334_v54  ;;  %v1344_v56 = vand.u32 2147483647, %v1334_v54 }
0x29b2   :  { %v1347_v0 = vor.u32 1.1754944e-38, %v1346_v61  ;;  %vm1345_vm7 = vcmp.eq.f32.partialorder %v1344_v56, 8.507059e+37 }
0x29b6   :  { %v1658_v55 = vpop.eup %1657 }
0x29b7   :  { %v1336_v57 = vmul.f32 %v1658_v55, %v1334_v54  ;;  %vm1341_vm4 = vweird.f32 %v1658_v55 }
0x29b8   :  { %vm1342_vm6 = vmor %vm1340_vm5, %vm1341_vm4 }
0x29b9   :  { %v1337_v58 = vsub.f32 1.0, %v1336_v57 }
0x29bb   :  { %v1338_v59 = vmul.f32 %v1658_v55, %v1337_v58 }
0x29bd   :  { %v1339_v60 = vadd.f32 %v1658_v55, %v1338_v59 }
0x29bf   :  { %v1343_v62 = vsel %vm1342_vm6, %v1658_v55, %v1339_v60 }
0x29c0   :  { %v1348_v3 = vsel %vm1345_vm7, %v1347_v0, %v1343_v62 }
0x29ff   :  { %v1354_v2 = vpop.permute.xlu2 %1353 }
0x2a00   :  { %v1356_v4 = vmul.f32 %v1354_v2, %v1348_v3 }
0x2a02   :  { %1358 = vrot.lane.b32.xlu0 %v1356_v4, %s1820_s11 }
0x2a74   :  { %v1359_v5 = vpop.permute.xlu0 %1358 }
0x2a75   :  { %v1361_v6 = vadd.f32 %v1359_v5, %v2079_v40 }
0x2a77   :  { %1659 = vtanh.f32 %v1361_v6 }
0x2a7d   :  { %v1660_v7 = vpop.eup %1659 }
0x2a7e   :  { %v1364_v9 = vrot.slane %v1660_v7, 2 }
0x2a80   :  { %v1366_v12 = vsub.f32 %v1305_v47, %v1364_v9 }
0x2a82   :  { %v1368_v1 = vrot.slane %v1366_v12, 6 }
0x2a84   :  { %1369 = vrot.lane.b32.xlu1 %v1368_v1, %s1824_s3 }
0x2af6   :  { %v1370_v35 = vpop.permute.xlu1 %1369 }
0x2af7   :  { %v1372_v14 = vmul.f32 %v1370_v35, %v1348_v3 }
0x2af9   :  { %1374 = vrot.lane.b32.xlu2 %v1372_v14, %s1823_s2 }
0x2b53   :  { %v1375_v44 = vpop.permute.xlu2 %1374 }
0x2b54   :  { %v1377_v17 = vadd.f32 %v1660_v7, %v1375_v44 }
0x2b56   :  { %v1378_v18 = vpack.c.bf16 %v1377_v17, %v1377_v17 }
0x2b58   :  { %v1386_v19 = vrot.slane %v1378_v18, 3 }
0x2b5a   :  { %1387 = vrot.lane.b32.xlu0 %v1386_v19, %s1820_s11 }
0x2bcc   :  { %v1388_v40 = vpop.permute.xlu0 %1387 }
0x2bcd   :  { %1534 = vmatmul.msk.bf16.vlgmr.msra.gmra.mxu3 %vm170_vm1, %v1388_v40 }
0x2c50   :  { %v1413_v21 = vpop.f32.mrf.mxu3 }
0x2c51   :  { %v1414_v22 = vadd.f32 %v1564_v20, %v1413_v21 }
0x2c53   :  { %1420 = vrot.lane.b32.xlu1 %v1414_v22, %s1826_s20  ;;  %1418 = vst.msk [vmem:[#allocation11] sm:$0x3] %vm1417_vm8, %v1414_v22 }
0x2c54   :  { %1434 = dma.vmem_to_hbm [thread:$0]  %s1430_s16, 32, %s1432_s19, [#allocation5]  }
0x2c58   :  { %v1415_v23 = vpop.f32.mrf.mxu3 }
0x2cc5   :  { %v1421_v24 = vpop.permute.xlu1 %1420 }
0x2cc6   :  { %1423 = vst.msk [vmem:[#allocation12] sm:$0x3] %vm1417_vm8, %v1421_v24 }
0x2cc7   :  { %1445 = dma.vmem_to_hbm [thread:$0]  %s1441_s22, 32, %s1443_s25, [#allocation13]  }
0x2cc8   :  { %1811 = dma.done.wait [#allocation5], 32  }
0x2cc9   :  { %1812 = vsyncadd [#allocation5], 4294967264 }
0x2cca   :  { %1813 = dma.done.wait [#allocation13], 32  }
0x2ccb   :  { %1814 = vsyncadd [#allocation13], 4294967264 }
0x2ccc   :  { %1454 = vsyncpa [#allocation4], 1 }
0x2ccd   :  { %1455 = vsyncpa [#allocation7], 1 }
0x2cce   :  { %1456 = vsyncpa [#allocation10], 1 }
0x2ccf   :  { %1457 = vsyncpa [#allocation5], 1 }
0x2cd0   :  { %1458 = vsyncpa [#allocation13], 1 }

</bundles_post_ra>
